<compile_context>
chip_gen: v6e
topology: v6e:2x2x1
jax: 0.10.0
libtpu: 0.0.40
codegen_flags: <defaults>
</compile_context>

<pallas_src>
import jax
import jax.numpy as jnp
import numpy as np
from jax.experimental import pallas as pl
from jax.experimental.pallas import tpu as pltpu


def _round_up(x, m):
    return ((x + m - 1) // m) * m


def _vmem_info():
    """(physical VMEM bytes, vmem_limit_bytes to request)."""
    try:
        cap = int(pltpu.get_tpu_info().vmem_capacity_bytes)
    except Exception:
        cap = 64 * 1024 * 1024            # conservative fallback (v7x per-TC)
    limit = int(min((cap * 3) // 4, 112 * 1024 * 1024))
    return cap, limit


def _tile_vmem_bytes(t, halo, c_in, c_out, input_affine, stats):
    """Per-step VMEM estimate: double-buffered streams + in-kernel temporaries
    (in-VMEM patch block, f32 matmul result, transformed-input copies)."""
    bf, f4 = 2, 4
    b = 2 * c_in * (t + halo) * bf          # x main + halo, double buffered
    b += 2 * c_out * t * bf                 # y out, double buffered
    b += 2 * c_out * 9 * c_in * bf          # weights
    b += 9 * c_in * t * bf                  # patch block (scratch)
    b += c_in * (t + halo) * bf             # concatenated main||halo temp
    b += c_out * t * f4                     # f32 matmul result
    if input_affine:
        b += 2 * 2 * (t + halo) * bf        # input masks (main + halo)
        b += c_in * (t + halo) * (f4 + bf)  # transformed-input temporaries
    if stats:
        b += 2 * t * bf                     # stats mask
        b += c_out * t * f4                 # masked f32 temp
    return b


def _choose_tile(q, halo, c_in, c_out, input_affine, stats, budget, cap):
    target = 8192 if cap >= (96 << 20) else 2048    # big tiles on 128 MiB parts
    t = min(_round_up(target, halo), _round_up(q, halo))
    t = max(t, halo)
    while t > halo and _tile_vmem_bytes(t, halo, c_in, c_out,
                                        input_affine, stats) > budget:
        t = max(halo, _round_up(t // 2, halo))
    return t


# --------------------------------------------------------------------------
# Conv kernel: in-VMEM im2col (main tile + halo tile -> 9 lane-shifted taps)
# + single MXU matmul; optional fused input affine (BN/bias of the previous
# layer) + ReLU + validity mask; optional masked per-tile BN-stat partials.
# --------------------------------------------------------------------------
def _make_conv_kernel(c_in, t, offsets, input_affine, compute_stats):
    def kernel(*refs):
        it = iter(refs)
        w_ref = next(it)                       # (c_out, 9*c_in)      bf16
        xm_ref = next(it)                      # (c_in, t)            bf16
        xh_ref = next(it)                      # (c_in, halo)         bf16
        if input_affine:
            sc_ref = next(it)                  # (c_in, 1)            f32
            sh_ref = next(it)                  # (c_in, 1)            f32
            mm_ref = next(it)                  # (1, t)               bf16
            mh_ref = next(it)                  # (1, halo)            bf16
        if compute_stats:
            mo_ref = next(it)                  # (1, t)               bf16
        y_ref = next(it)                       # (c_out, t)           bf16
        if compute_stats:
            sum_ref = next(it)                 # (1, c_out, 1)        f32
            ssq_ref = next(it)                 # (1, c_out, 1)        f32
        patches_ref = next(it)                 # (9*c_in, t) scratch  bf16

        xm = xm_ref[...]
        xh = xh_ref[...]
        if input_affine:
            sc = sc_ref[...]
            sh = sh_ref[...]

            def transform(v, m):
                v32 = v.astype(jnp.float32) * sc + sh
                v32 = jnp.maximum(v32, 0.0)
                # jnp.where (not multiply) so stale / garbage values in the
                # previous layer's unused columns can never leak NaN/Inf.
                return jnp.where(m != 0, v32, 0.0).astype(jnp.bfloat16)

            xm = transform(xm, mm_ref[...])
            xh = transform(xh, mh_ref[...])

        combined = jnp.concatenate([xm, xh], axis=1)       # (c_in, t + halo)

        # In-VMEM im2col: 9 lane-shifted copies of the tile.
        for idx, off in enumerate(offsets):
            patches_ref[idx * c_in:(idx + 1) * c_in, :] = combined[:, off:off + t]

        y = jnp.dot(w_ref[...], patches_ref[...],
                    preferred_element_type=jnp.float32)    # (c_out, t) f32
        y_ref[...] = y.astype(y_ref.dtype)

        if compute_stats:
            # Garbage columns (frame padding / tile tail) are multiplied by 0;
            # the glue divides by the TRUE pixel count.
            mo = mo_ref[...].astype(jnp.float32)
            ym = y * mo
            sum_ref[...] = jnp.sum(ym, axis=-1, keepdims=True)[None]
            ssq_ref[...] = jnp.sum(ym * ym, axis=-1, keepdims=True)[None]

    return kernel


def _conv_layer(x_flat, w2d, *, t, halo, offsets, vmem_limit,
                in_affine=None, in_mask=None, stats_mask=None):
    """x_flat: (C_in, Q_pad) bf16 flat padded frames; w2d: (C_out, 9*C_in) bf16.
    Returns (y (C_out, Q_pad) bf16, sum partials | None, ssq partials | None)."""
    c_in, l = x_flat.shape
    c_out, k = w2d.shape
    assert l % t == 0 and t % halo == 0
    n_tiles = l // t
    hb = t // halo
    last_hb = l // halo - 1        # halo clamp for the final tile (its valid
                                   # outputs never need data beyond the array)

    input_affine = in_affine is not None
    compute_stats = stats_mask is not None

    def halo_map(i):
        return (0, jnp.minimum((i + 1) * hb, last_hb))

    in_specs = [
        pl.BlockSpec((c_out, k), lambda i: (0, 0)),
        pl.BlockSpec((c_in, t), lambda i: (0, i)),
        pl.BlockSpec((c_in, halo), halo_map),
    ]
    operands = [w2d, x_flat, x_flat]
    if input_affine:
        scale, shift = in_affine
        in_specs += [
            pl.BlockSpec((c_in, 1), lambda i: (0, 0)),
            pl.BlockSpec((c_in, 1), lambda i: (0, 0)),
            pl.BlockSpec((1, t), lambda i: (0, i)),
            pl.BlockSpec((1, halo), halo_map),
        ]
        operands += [scale, shift, in_mask, in_mask]
    if compute_stats:
        in_specs.append(pl.BlockSpec((1, t), lambda i: (0, i)))
        operands.append(stats_mask)

    out_shape = [jax.ShapeDtypeStruct((c_out, l), jnp.bfloat16)]
    out_specs = [pl.BlockSpec((c_out, t), lambda i: (0, i))]
    if compute_stats:
        out_shape.append(jax.ShapeDtypeStruct((n_tiles, c_out, 1), jnp.float32))
        out_shape.append(jax.ShapeDtypeStruct((n_tiles, c_out, 1), jnp.float32))
        out_specs.append(pl.BlockSpec((1, c_out, 1), lambda i: (i, 0, 0)))
        out_specs.append(pl.BlockSpec((1, c_out, 1), lambda i: (i, 0, 0)))

    kernel = _make_conv_kernel(c_in, t, offsets, input_affine, compute_stats)
    res = pl.pallas_call(
        kernel,
        grid=(n_tiles,),
        in_specs=in_specs,
        out_specs=tuple(out_specs),
        out_shape=tuple(out_shape),
        scratch_shapes=[pltpu.VMEM((k, t), jnp.bfloat16)],
        compiler_params=pltpu.CompilerParams(
            dimension_semantics=("parallel",),
            vmem_limit_bytes=vmem_limit),
    )(*operands)

    if compute_stats:
        y, s, q = res
        return y, s, q
    return res[0], None, None


# --------------------------------------------------------------------------
# Glue: frame padding, flat layout, masks, BN stat reduction, composition.
# --------------------------------------------------------------------------
def inconv_forward(x, params, *, bn=True, eps=1e-5):
    n, c_in, h, w = x.shape
    c_out = params["w1"].shape[0]

    s_row = w + 3                        # padded row stride
    f_img = (h + 3) * s_row              # padded frame size per image
    q = n * f_img                        # flat padded pixel count
    p_valid = n * h * w                  # TRUE pixel count (stats divisor)
    offsets = [dy * s_row + dx for dy in range(3) for dx in range(3)]
    halo = _round_up(2 * s_row + 2, 128)

    cap, vmem_limit = _vmem_info()
    # One tile size for both layers, sized for the heavier second conv.
    t = _choose_tile(q, halo, c_out, c_out, True, bn, vmem_limit // 2, cap)
    q_pad = _round_up(q, t)

    # Layer-1 input: valid pixel (h, w) sits at frame coords (h+2, w+2) so each
    # conv shifts its output by (-1, -1) and both convs share identical tap
    # offsets; the zero ring the first conv needs physically exists.
    xp = jnp.pad(x.astype(jnp.bfloat16), ((0, 0), (0, 0), (2, 1), (2, 1)))
    x_flat = jnp.transpose(xp, (1, 0, 2, 3)).reshape(c_in, q)
    x_flat = jnp.pad(x_flat, ((0, 0), (0, q_pad - q)))

    rows = jnp.arange(h + 3)
    cols = jnp.arange(w + 3)

    def flat_mask(rlo, rhi, clo, chi):
        m = (((rows >= rlo) & (rows < rhi))[:, None]
             & ((cols >= clo) & (cols < chi))[None, :])
        m = jnp.broadcast_to(m[None], (n, h + 3, w + 3)).reshape(1, q)
        return jnp.pad(m.astype(jnp.bfloat16), ((0, 0), (0, q_pad - q)))

    m1 = flat_mask(1, h + 1, 1, w + 1)   # conv-1 valid outputs == conv-2 inputs
    m2 = flat_mask(0, h, 0, w)           # conv-2 valid outputs

    def w9(wt):
        co = wt.shape[0]
        # row order (dy*3+dx)*C_in + ci  -- matches the in-kernel patch build
        return jnp.transpose(wt, (0, 2, 3, 1)).reshape(co, -1).astype(jnp.bfloat16)

    # ----- layer 1: conv only (training-mode BN cancels the conv bias) -------
    y1, s1, q1 = _conv_layer(
        x_flat, w9(params["w1"]), t=t, halo=halo, offsets=offsets,
        vmem_limit=vmem_limit, stats_mask=m1 if bn else None)

    if bn:
        mean1 = jnp.sum(s1, axis=(0, 2)) / p_valid
        var1 = jnp.sum(q1, axis=(0, 2)) / p_valid - mean1 * mean1
        inv1 = jax.lax.rsqrt(var1 + eps)
        scale1 = params["g1"] * inv1
        shift1 = params["be1"] - mean1 * scale1
    else:
        scale1 = jnp.ones((c_out,), jnp.float32)
        shift1 = params["b1"].astype(jnp.float32)

    # ----- layer 2: BN/bias + ReLU of layer 1 fused into the input load ------
    y2, s2, q2 = _conv_layer(
        y1, w9(params["w2"]), t=t, halo=halo, offsets=offsets,
        vmem_limit=vmem_limit,
        in_affine=(scale1.reshape(c_out, 1).astype(jnp.float32),
                   shift1.reshape(c_out, 1).astype(jnp.float32)),
        in_mask=m1,
        stats_mask=m2 if bn else None)

    if bn:
        mean2 = jnp.sum(s2, axis=(0, 2)) / p_valid
        var2 = jnp.sum(q2, axis=(0, 2)) / p_valid - mean2 * mean2
        inv2 = jax.lax.rsqrt(var2 + eps)
        scale2 = params["g2"] * inv2
        shift2 = params["be2"] - mean2 * scale2
    else:
        scale2 = jnp.ones((c_out,), jnp.float32)
        shift2 = params["b2"].astype(jnp.float32)

    # Final BN/bias + ReLU, valid-region extraction, NCHW restore (XLA glue).
    y2v = y2[:, :q].reshape(c_out, n, h + 3, w + 3)[:, :, :h, :w]
    out = jnp.maximum(
        y2v.astype(jnp.float32) * scale2[:, None, None, None]
        + shift2[:, None, None, None], 0.0)
    return jnp.transpose(out, (1, 0, 2, 3))          # (N, C_out, H, W) f32


def init_inconv_params(key, in_ch, out_ch):
    """PyTorch-style defaults (uniform +/- 1/sqrt(fan_in); BN gamma=1, beta=0)."""
    ks = jax.random.split(key, 4)

    def conv_init(kw, kb, cin, cout):
        bound = 1.0 / np.sqrt(cin * 9)
        wgt = jax.random.uniform(kw, (cout, cin, 3, 3), jnp.float32, -bound, bound)
        b = jax.random.uniform(kb, (cout,), jnp.float32, -bound, bound)
        return wgt, b

    w1, b1 = conv_init(ks[0], ks[1], in_ch, out_ch)
    w2, b2 = conv_init(ks[2], ks[3], out_ch, out_ch)
    g = jnp.ones((out_ch,), jnp.float32)
    be = jnp.zeros((out_ch,), jnp.float32)
    return dict(w1=w1, b1=b1, g1=g, be1=be, w2=w2, b2=b2, g2=g, be2=be)


# --------------------------------------------------------------------------
# References:
#  - _ref_forward_tight mirrors the kernel's bf16 streaming / quantization
#  - _ref_forward_f32  is the exact f32 module semantics (loose sanity check)
# --------------------------------------------------------------------------
def _ref_forward_tight(x, params, *, bn=True, eps=1e-5):
    def conv(xb, wt):
        return jax.lax.conv_general_dilated(
            xb.astype(jnp.bfloat16), wt.astype(jnp.bfloat16), (1, 1), "SAME",
            dimension_numbers=("NCHW", "OIHW", "NCHW"),
            preferred_element_type=jnp.float32)

    def affine_relu(y, g, be, b):
        if bn:
            mean = jnp.mean(y, axis=(0, 2, 3))
            var = jnp.mean(y * y, axis=(0, 2, 3)) - mean * mean
            inv = jax.lax.rsqrt(var + eps)
            scale = g * inv
            shift = be - mean * scale
        else:
            scale = jnp.ones_like(b)
            shift = b
        yq = y.astype(jnp.bfloat16).astype(jnp.float32)   # mirrors bf16 y store
        return jnp.maximum(yq * scale[None, :, None, None]
                           + shift[None, :, None, None], 0.0)

    y1 = conv(x, params["w1"])
    h1 = affine_relu(y1, params["g1"], params["be1"], params["b1"]).astype(jnp.bfloat16)
    y2 = conv(h1.astype(jnp.float32), params["w2"])
    return affine_relu(y2, params["g2"], params["be2"], params["b2"])


def _ref_forward_f32(x, params, *, bn=True, eps=1e-5):
    def layer(xx, wt, b, g, be):
        y = jax.lax.conv_general_dilated(
            xx, wt, (1, 1), "SAME", dimension_numbers=("NCHW", "OIHW", "NCHW"))
        y = y + b[None, :, None, None]
        if bn:
            mean = jnp.mean(y, axis=(0, 2, 3), keepdims=True)
            var = jnp.var(y, axis=(0, 2, 3), keepdims=True)
            y = (y - mean) / jnp.sqrt(var + eps)
            y = y * g[None, :, None, None] + be[None, :, None, None]
        return jnp.maximum(y, 0.0)

    y = layer(x, params["w1"], params["b1"], params["g1"], params["be1"])
    return layer(y, params["w2"], params["b2"], params["g2"], params["be2"])


if __name__ == "__main__":
    key = jax.random.PRNGKey(0)
    kx, kp = jax.random.split(key)

    N, IN_CH, OUT_CH, H, W = 2, 4, 8, 16, 16
    x = jax.random.normal(kx, (N, IN_CH, H, W), jnp.float32)
    params = init_inconv_params(kp, IN_CH, OUT_CH)

    # bn=True path (the spec's default configuration).
    fwd_bn = jax.jit(lambda xx, pp: inconv_forward(xx, pp, bn=True))
    out = jax.block_until_ready(fwd_bn(x, params))
    assert out.shape == (N, OUT_CH, H, W)

    ref_tight = jax.block_until_ready(_ref_forward_tight(x, params, bn=True))
    np.testing.assert_allclose(np.asarray(out), np.asarray(ref_tight),
                               rtol=5e-3, atol=5e-3)

    ref_f32 = jax.block_until_ready(_ref_forward_f32(x, params, bn=True))
    np.testing.assert_allclose(np.asarray(out), np.asarray(ref_f32),
                               rtol=5e-2, atol=5e-2)

    # bn=False path (bias + ReLU fused into the consumer / final epilogue).
    fwd_nobn = jax.jit(lambda xx, pp: inconv_forward(xx, pp, bn=False))
    out_nb = jax.block_until_ready(fwd_nobn(x, params))
    ref_nb = jax.block_until_ready(_ref_forward_tight(x, params, bn=False))
    np.testing.assert_allclose(np.asarray(out_nb), np.asarray(ref_nb),
                               rtol=5e-3, atol=5e-3)

    print("KERNEL_OK")
</pallas_src>

<mosaic_0001>
module attributes {stable_mosaic.version = 11 : i64} {
  func.func @kernel(%arg0: i32, %arg1: memref<8x36xbf16, #tpu.memory_space<vmem>>, %arg2: memref<4x768xbf16, #tpu.memory_space<vmem>>, %arg3: memref<4x128xbf16, #tpu.memory_space<vmem>>, %arg4: memref<1x768xbf16, #tpu.memory_space<vmem>>, %arg5: memref<8x768xbf16, #tpu.memory_space<vmem>>, %arg6: memref<1x8x1xf32, #tpu.memory_space<vmem>>, %arg7: memref<1x8x1xf32, #tpu.memory_space<vmem>>, %arg8: memref<36x768xbf16, #tpu.memory_space<vmem>>) attributes {dimension_semantics = [#tpu.dimension_semantics<parallel>], iteration_bounds = array<i64: 1>, scalar_prefetch = 0 : i64, scratch_operands = 1 : i64, tpu.core_type = #tpu.core_type<tc>, window_params = [{pipeline_mode = #tpu.pipeline_mode<synchronous>, transform_indices = @transform_0, window_bounds = array<i64: 8, 36>}, {transform_indices = @transform_1, window_bounds = array<i64: 4, 768>}, {transform_indices = @transform_2, window_bounds = array<i64: 4, 128>}, {transform_indices = @transform_3, window_bounds = array<i64: 1, 768>}, {transform_indices = @transform_4, window_bounds = array<i64: 8, 768>}, {transform_indices = @transform_5, window_bounds = array<i64: 1, 8, 1>}, {transform_indices = @transform_6, window_bounds = array<i64: 1, 8, 1>}]} {
    %c0 = arith.constant 0 : index
    %c0_0 = arith.constant 0 : index
    %0 = vector.load %arg2[%c0, %c0_0] : memref<4x768xbf16, #tpu.memory_space<vmem>>, vector<4x768xbf16>
    %c0_1 = arith.constant 0 : index
    %c0_2 = arith.constant 0 : index
    %1 = vector.load %arg3[%c0_1, %c0_2] : memref<4x128xbf16, #tpu.memory_space<vmem>>, vector<4x128xbf16>
    %2 = tpu.concatenate %0, %1 in 1 : vector<4x768xbf16>, vector<4x128xbf16> -> vector<4x896xbf16>
    %3 = vector.extract_strided_slice %2 {offsets = [0, 0], sizes = [4, 768], strides = [1, 1]} : vector<4x896xbf16> to vector<4x768xbf16>
    %c0_3 = arith.constant 0 : index
    %c0_4 = arith.constant 0 : index
    %4 = vector.load %arg8[%c0_3, %c0_4] : memref<36x768xbf16, #tpu.memory_space<vmem>>, vector<4x768xbf16>
    tpu.vector_store %arg8[%c0_3, %c0_4], %3 {strides = array<i32>} : memref<36x768xbf16, #tpu.memory_space<vmem>>, vector<4x768xbf16>,
    %5 = vector.extract_strided_slice %2 {offsets = [0, 1], sizes = [4, 768], strides = [1, 1]} : vector<4x896xbf16> to vector<4x768xbf16>
    %c4 = arith.constant 4 : index
    %c0_5 = arith.constant 0 : index
    %6 = vector.load %arg8[%c4, %c0_5] : memref<36x768xbf16, #tpu.memory_space<vmem>>, vector<4x768xbf16>
    tpu.vector_store %arg8[%c4, %c0_5], %5 {strides = array<i32>} : memref<36x768xbf16, #tpu.memory_space<vmem>>, vector<4x768xbf16>,
    %7 = vector.extract_strided_slice %2 {offsets = [0, 2], sizes = [4, 768], strides = [1, 1]} : vector<4x896xbf16> to vector<4x768xbf16>
    %c8 = arith.constant 8 : index
    %c0_6 = arith.constant 0 : index
    %8 = vector.load %arg8[%c8, %c0_6] : memref<36x768xbf16, #tpu.memory_space<vmem>>, vector<4x768xbf16>
    tpu.vector_store %arg8[%c8, %c0_6], %7 {strides = array<i32>} : memref<36x768xbf16, #tpu.memory_space<vmem>>, vector<4x768xbf16>,
    %9 = vector.extract_strided_slice %2 {offsets = [0, 19], sizes = [4, 768], strides = [1, 1]} : vector<4x896xbf16> to vector<4x768xbf16>
    %c12 = arith.constant 12 : index
    %c0_7 = arith.constant 0 : index
    %10 = vector.load %arg8[%c12, %c0_7] : memref<36x768xbf16, #tpu.memory_space<vmem>>, vector<4x768xbf16>
    tpu.vector_store %arg8[%c12, %c0_7], %9 {strides = array<i32>} : memref<36x768xbf16, #tpu.memory_space<vmem>>, vector<4x768xbf16>,
    %11 = vector.extract_strided_slice %2 {offsets = [0, 20], sizes = [4, 768], strides = [1, 1]} : vector<4x896xbf16> to vector<4x768xbf16>
    %c16 = arith.constant 16 : index
    %c0_8 = arith.constant 0 : index
    %12 = vector.load %arg8[%c16, %c0_8] : memref<36x768xbf16, #tpu.memory_space<vmem>>, vector<4x768xbf16>
    tpu.vector_store %arg8[%c16, %c0_8], %11 {strides = array<i32>} : memref<36x768xbf16, #tpu.memory_space<vmem>>, vector<4x768xbf16>,
    %13 = vector.extract_strided_slice %2 {offsets = [0, 21], sizes = [4, 768], strides = [1, 1]} : vector<4x896xbf16> to vector<4x768xbf16>
    %c20 = arith.constant 20 : index
    %c0_9 = arith.constant 0 : index
    %14 = vector.load %arg8[%c20, %c0_9] : memref<36x768xbf16, #tpu.memory_space<vmem>>, vector<4x768xbf16>
    tpu.vector_store %arg8[%c20, %c0_9], %13 {strides = array<i32>} : memref<36x768xbf16, #tpu.memory_space<vmem>>, vector<4x768xbf16>,
    %15 = vector.extract_strided_slice %2 {offsets = [0, 38], sizes = [4, 768], strides = [1, 1]} : vector<4x896xbf16> to vector<4x768xbf16>
    %c24 = arith.constant 24 : index
    %c0_10 = arith.constant 0 : index
    %16 = vector.load %arg8[%c24, %c0_10] : memref<36x768xbf16, #tpu.memory_space<vmem>>, vector<4x768xbf16>
    tpu.vector_store %arg8[%c24, %c0_10], %15 {strides = array<i32>} : memref<36x768xbf16, #tpu.memory_space<vmem>>, vector<4x768xbf16>,
    %17 = vector.extract_strided_slice %2 {offsets = [0, 39], sizes = [4, 768], strides = [1, 1]} : vector<4x896xbf16> to vector<4x768xbf16>
    %c28 = arith.constant 28 : index
    %c0_11 = arith.constant 0 : index
    %18 = vector.load %arg8[%c28, %c0_11] : memref<36x768xbf16, #tpu.memory_space<vmem>>, vector<4x768xbf16>
    tpu.vector_store %arg8[%c28, %c0_11], %17 {strides = array<i32>} : memref<36x768xbf16, #tpu.memory_space<vmem>>, vector<4x768xbf16>,
    %19 = vector.extract_strided_slice %2 {offsets = [0, 40], sizes = [4, 768], strides = [1, 1]} : vector<4x896xbf16> to vector<4x768xbf16>
    %c32 = arith.constant 32 : index
    %c0_12 = arith.constant 0 : index
    %20 = vector.load %arg8[%c32, %c0_12] : memref<36x768xbf16, #tpu.memory_space<vmem>>, vector<4x768xbf16>
    tpu.vector_store %arg8[%c32, %c0_12], %19 {strides = array<i32>} : memref<36x768xbf16, #tpu.memory_space<vmem>>, vector<4x768xbf16>,
    %c0_13 = arith.constant 0 : index
    %c0_14 = arith.constant 0 : index
    %21 = vector.load %arg1[%c0_13, %c0_14] : memref<8x36xbf16, #tpu.memory_space<vmem>>, vector<8x36xbf16>
    %c0_15 = arith.constant 0 : index
    %c0_16 = arith.constant 0 : index
    %22 = vector.load %arg8[%c0_15, %c0_16] : memref<36x768xbf16, #tpu.memory_space<vmem>>, vector<36x768xbf16>
    %cst = arith.constant dense<0.000000e+00> : vector<8x768xf32>
    %23 = tpu.matmul %21, %22, %cst {dimension_numbers = #tpu.dot_dimension_numbers<[1], [0], [0], [1], [0, 0, 1, 1], [], []>} : vector<8x36xbf16>, vector<36x768xbf16>, vector<8x768xf32> -> vector<8x768xf32>
    %24 = arith.truncf %23 : vector<8x768xf32> to vector<8x768xbf16>
    %c0_17 = arith.constant 0 : index
    %c0_18 = arith.constant 0 : index
    %25 = vector.load %arg5[%c0_17, %c0_18] : memref<8x768xbf16, #tpu.memory_space<vmem>>, vector<8x768xbf16>
    tpu.vector_store %arg5[%c0_17, %c0_18], %24 {strides = array<i32>} : memref<8x768xbf16, #tpu.memory_space<vmem>>, vector<8x768xbf16>,
    %c0_19 = arith.constant 0 : index
    %c0_20 = arith.constant 0 : index
    %26 = vector.load %arg4[%c0_19, %c0_20] : memref<1x768xbf16, #tpu.memory_space<vmem>>, vector<1x768xbf16>
    %27 = arith.extf %26 : vector<1x768xbf16> to vector<1x768xf32>
    %28 = vector.broadcast %27 : vector<1x768xf32> to vector<8x768xf32>
    %29 = arith.mulf %23, %28 : vector<8x768xf32>
    %cst_21 = arith.constant dense<0.000000e+00> : vector<8xf32>
    %30 = vector.multi_reduction <add>, %29, %cst_21 [1] : vector<8x768xf32> to vector<8xf32>
    %31 = vector.shape_cast %30 : vector<8xf32> to vector<8x1xf32>
    %32 = vector.shape_cast %31 : vector<8x1xf32> to vector<1x8x1xf32>
    %c0_22 = arith.constant 0 : index
    %c0_23 = arith.constant 0 : index
    %c0_24 = arith.constant 0 : index
    %33 = vector.load %arg6[%c0_22, %c0_23, %c0_24] : memref<1x8x1xf32, #tpu.memory_space<vmem>>, vector<1x8x1xf32>
    tpu.vector_store %arg6[%c0_22, %c0_23, %c0_24], %32 {strides = array<i32>} : memref<1x8x1xf32, #tpu.memory_space<vmem>>, vector<1x8x1xf32>,
    %34 = arith.mulf %29, %29 : vector<8x768xf32>
    %cst_25 = arith.constant dense<0.000000e+00> : vector<8xf32>
    %35 = vector.multi_reduction <add>, %34, %cst_25 [1] : vector<8x768xf32> to vector<8xf32>
    %36 = vector.shape_cast %35 : vector<8xf32> to vector<8x1xf32>
    %37 = vector.shape_cast %36 : vector<8x1xf32> to vector<1x8x1xf32>
    %c0_26 = arith.constant 0 : index
    %c0_27 = arith.constant 0 : index
    %c0_28 = arith.constant 0 : index
    %38 = vector.load %arg7[%c0_26, %c0_27, %c0_28] : memref<1x8x1xf32, #tpu.memory_space<vmem>>, vector<1x8x1xf32>
    tpu.vector_store %arg7[%c0_26, %c0_27, %c0_28], %37 {strides = array<i32>} : memref<1x8x1xf32, #tpu.memory_space<vmem>>, vector<1x8x1xf32>,
    return
  }
  func.func @transform_0(%arg0: i32) -> (i32, i32) {
    %c0_i32 = arith.constant 0 : i32
    %c0_i32_0 = arith.constant 0 : i32
    %c0_i32_1 = arith.constant 0 : i32
    return %c0_i32, %c0_i32_0 : i32, i32
  }
  func.func @transform_1(%arg0: i32) -> (i32, i32) {
    %c0_i32 = arith.constant 0 : i32
    %c0_i32_0 = arith.constant 0 : i32
    return %c0_i32, %arg0 : i32, i32
  }
  func.func @transform_2(%arg0: i32) -> (i32, i32) {
    %c1_i32 = arith.constant 1 : i32
    %0 = arith.addi %arg0, %c1_i32 : i32
    %c6_i32 = arith.constant 6 : i32
    %1 = arith.muli %0, %c6_i32 : i32
    %c5_i32 = arith.constant 5 : i32
    %2 = arith.minsi %1, %c5_i32 : i32
    %c0_i32 = arith.constant 0 : i32
    %c0_i32_0 = arith.constant 0 : i32
    return %c0_i32, %2 : i32, i32
  }
  func.func @transform_3(%arg0: i32) -> (i32, i32) {
    %c0_i32 = arith.constant 0 : i32
    %c0_i32_0 = arith.constant 0 : i32
    return %c0_i32, %arg0 : i32, i32
  }
  func.func @transform_4(%arg0: i32) -> (i32, i32) {
    %c0_i32 = arith.constant 0 : i32
    %c0_i32_0 = arith.constant 0 : i32
    return %c0_i32, %arg0 : i32, i32
  }
  func.func @transform_5(%arg0: i32) -> (i32, i32, i32) {
    %c0_i32 = arith.constant 0 : i32
    %c0_i32_0 = arith.constant 0 : i32
    %c0_i32_1 = arith.constant 0 : i32
    return %arg0, %c0_i32, %c0_i32_0 : i32, i32, i32
  }
  func.func @transform_6(%arg0: i32) -> (i32, i32, i32) {
    %c0_i32 = arith.constant 0 : i32
    %c0_i32_0 = arith.constant 0 : i32
    %c0_i32_1 = arith.constant 0 : i32
    return %arg0, %c0_i32, %c0_i32_0 : i32, i32, i32
  }
}

module attributes {stable_mosaic.version = 11 : i64} {
  func.func @kernel(%arg0: i32, %arg1: memref<8x72xbf16, #tpu.memory_space<vmem>>, %arg2: memref<8x768xbf16, #tpu.memory_space<vmem>>, %arg3: memref<8x128xbf16, #tpu.memory_space<vmem>>, %arg4: memref<8x1xf32, #tpu.memory_space<vmem>>, %arg5: memref<8x1xf32, #tpu.memory_space<vmem>>, %arg6: memref<1x768xbf16, #tpu.memory_space<vmem>>, %arg7: memref<1x128xbf16, #tpu.memory_space<vmem>>, %arg8: memref<1x768xbf16, #tpu.memory_space<vmem>>, %arg9: memref<8x768xbf16, #tpu.memory_space<vmem>>, %arg10: memref<1x8x1xf32, #tpu.memory_space<vmem>>, %arg11: memref<1x8x1xf32, #tpu.memory_space<vmem>>, %arg12: memref<72x768xbf16, #tpu.memory_space<vmem>>) attributes {dimension_semantics = [#tpu.dimension_semantics<parallel>], iteration_bounds = array<i64: 1>, scalar_prefetch = 0 : i64, scratch_operands = 1 : i64, tpu.core_type = #tpu.core_type<tc>, window_params = [{pipeline_mode = #tpu.pipeline_mode<synchronous>, transform_indices = @transform_0, window_bounds = array<i64: 8, 72>}, {transform_indices = @transform_1, window_bounds = array<i64: 8, 768>}, {transform_indices = @transform_2, window_bounds = array<i64: 8, 128>}, {pipeline_mode = #tpu.pipeline_mode<synchronous>, transform_indices = @transform_3, window_bounds = array<i64: 8, 1>}, {pipeline_mode = #tpu.pipeline_mode<synchronous>, transform_indices = @transform_4, window_bounds = array<i64: 8, 1>}, {transform_indices = @transform_5, window_bounds = array<i64: 1, 768>}, {transform_indices = @transform_6, window_bounds = array<i64: 1, 128>}, {transform_indices = @transform_7, window_bounds = array<i64: 1, 768>}, {transform_indices = @transform_8, window_bounds = array<i64: 8, 768>}, {transform_indices = @transform_9, window_bounds = array<i64: 1, 8, 1>}, {transform_indices = @transform_10, window_bounds = array<i64: 1, 8, 1>}]} {
    %c0 = arith.constant 0 : index
    %c0_0 = arith.constant 0 : index
    %0 = vector.load %arg2[%c0, %c0_0] : memref<8x768xbf16, #tpu.memory_space<vmem>>, vector<8x768xbf16>
    %c0_1 = arith.constant 0 : index
    %c0_2 = arith.constant 0 : index
    %1 = vector.load %arg3[%c0_1, %c0_2] : memref<8x128xbf16, #tpu.memory_space<vmem>>, vector<8x128xbf16>
    %c0_3 = arith.constant 0 : index
    %c0_4 = arith.constant 0 : index
    %2 = vector.load %arg4[%c0_3, %c0_4] : memref<8x1xf32, #tpu.memory_space<vmem>>, vector<8x1xf32>
    %c0_5 = arith.constant 0 : index
    %c0_6 = arith.constant 0 : index
    %3 = vector.load %arg5[%c0_5, %c0_6] : memref<8x1xf32, #tpu.memory_space<vmem>>, vector<8x1xf32>
    %c0_7 = arith.constant 0 : index
    %c0_8 = arith.constant 0 : index
    %4 = vector.load %arg6[%c0_7, %c0_8] : memref<1x768xbf16, #tpu.memory_space<vmem>>, vector<1x768xbf16>
    %5 = arith.extf %0 : vector<8x768xbf16> to vector<8x768xf32>
    %6 = vector.broadcast %2 : vector<8x1xf32> to vector<8x768xf32>
    %7 = arith.mulf %5, %6 : vector<8x768xf32>
    %8 = vector.broadcast %3 : vector<8x1xf32> to vector<8x768xf32>
    %9 = arith.addf %7, %8 : vector<8x768xf32>
    %cst = arith.constant 0.000000e+00 : f32
    %10 = vector.broadcast %cst : f32 to vector<8x768xf32>
    %11 = arith.maximumf %9, %10 : vector<8x768xf32>
    %cst_9 = arith.constant 0.000000e+00 : bf16
    %12 = vector.broadcast %cst_9 : bf16 to vector<1x768xbf16>
    %13 = arith.cmpf one, %4, %12 : vector<1x768xbf16>
    %cst_10 = arith.constant 0.000000e+00 : f32
    %14 = vector.shape_cast %13 : vector<1x768xi1> to vector<1x768xi1>
    %15 = vector.broadcast %14 : vector<1x768xi1> to vector<8x768xi1>
    %16 = vector.broadcast %cst_10 : f32 to vector<8x768xf32>
    %17 = arith.select %15, %11, %16 : vector<8x768xi1>, vector<8x768xf32>
    %18 = arith.truncf %17 : vector<8x768xf32> to vector<8x768xbf16>
    %c0_11 = arith.constant 0 : index
    %c0_12 = arith.constant 0 : index
    %19 = vector.load %arg7[%c0_11, %c0_12] : memref<1x128xbf16, #tpu.memory_space<vmem>>, vector<1x128xbf16>
    %20 = arith.extf %1 : vector<8x128xbf16> to vector<8x128xf32>
    %21 = vector.broadcast %2 : vector<8x1xf32> to vector<8x128xf32>
    %22 = arith.mulf %20, %21 : vector<8x128xf32>
    %23 = vector.broadcast %3 : vector<8x1xf32> to vector<8x128xf32>
    %24 = arith.addf %22, %23 : vector<8x128xf32>
    %cst_13 = arith.constant 0.000000e+00 : f32
    %25 = vector.broadcast %cst_13 : f32 to vector<8x128xf32>
    %26 = arith.maximumf %24, %25 : vector<8x128xf32>
    %cst_14 = arith.constant 0.000000e+00 : bf16
    %27 = vector.broadcast %cst_14 : bf16 to vector<1x128xbf16>
    %28 = arith.cmpf one, %19, %27 : vector<1x128xbf16>
    %cst_15 = arith.constant 0.000000e+00 : f32
    %29 = vector.shape_cast %28 : vector<1x128xi1> to vector<1x128xi1>
    %30 = vector.broadcast %29 : vector<1x128xi1> to vector<8x128xi1>
    %31 = vector.broadcast %cst_15 : f32 to vector<8x128xf32>
    %32 = arith.select %30, %26, %31 : vector<8x128xi1>, vector<8x128xf32>
    %33 = arith.truncf %32 : vector<8x128xf32> to vector<8x128xbf16>
    %34 = tpu.concatenate %18, %33 in 1 : vector<8x768xbf16>, vector<8x128xbf16> -> vector<8x896xbf16>
    %35 = vector.extract_strided_slice %34 {offsets = [0, 0], sizes = [8, 768], strides = [1, 1]} : vector<8x896xbf16> to vector<8x768xbf16>
    %c0_16 = arith.constant 0 : index
    %c0_17 = arith.constant 0 : index
    %36 = vector.load %arg12[%c0_16, %c0_17] : memref<72x768xbf16, #tpu.memory_space<vmem>>, vector<8x768xbf16>
    tpu.vector_store %arg12[%c0_16, %c0_17], %35 {strides = array<i32>} : memref<72x768xbf16, #tpu.memory_space<vmem>>, vector<8x768xbf16>,
    %37 = vector.extract_strided_slice %34 {offsets = [0, 1], sizes = [8, 768], strides = [1, 1]} : vector<8x896xbf16> to vector<8x768xbf16>
    %c8 = arith.constant 8 : index
    %c0_18 = arith.constant 0 : index
    %38 = vector.load %arg12[%c8, %c0_18] : memref<72x768xbf16, #tpu.memory_space<vmem>>, vector<8x768xbf16>
    tpu.vector_store %arg12[%c8, %c0_18], %37 {strides = array<i32>} : memref<72x768xbf16, #tpu.memory_space<vmem>>, vector<8x768xbf16>,
    %39 = vector.extract_strided_slice %34 {offsets = [0, 2], sizes = [8, 768], strides = [1, 1]} : vector<8x896xbf16> to vector<8x768xbf16>
    %c16 = arith.constant 16 : index
    %c0_19 = arith.constant 0 : index
    %40 = vector.load %arg12[%c16, %c0_19] : memref<72x768xbf16, #tpu.memory_space<vmem>>, vector<8x768xbf16>
    tpu.vector_store %arg12[%c16, %c0_19], %39 {strides = array<i32>} : memref<72x768xbf16, #tpu.memory_space<vmem>>, vector<8x768xbf16>,
    %41 = vector.extract_strided_slice %34 {offsets = [0, 19], sizes = [8, 768], strides = [1, 1]} : vector<8x896xbf16> to vector<8x768xbf16>
    %c24 = arith.constant 24 : index
    %c0_20 = arith.constant 0 : index
    %42 = vector.load %arg12[%c24, %c0_20] : memref<72x768xbf16, #tpu.memory_space<vmem>>, vector<8x768xbf16>
    tpu.vector_store %arg12[%c24, %c0_20], %41 {strides = array<i32>} : memref<72x768xbf16, #tpu.memory_space<vmem>>, vector<8x768xbf16>,
    %43 = vector.extract_strided_slice %34 {offsets = [0, 20], sizes = [8, 768], strides = [1, 1]} : vector<8x896xbf16> to vector<8x768xbf16>
    %c32 = arith.constant 32 : index
    %c0_21 = arith.constant 0 : index
    %44 = vector.load %arg12[%c32, %c0_21] : memref<72x768xbf16, #tpu.memory_space<vmem>>, vector<8x768xbf16>
    tpu.vector_store %arg12[%c32, %c0_21], %43 {strides = array<i32>} : memref<72x768xbf16, #tpu.memory_space<vmem>>, vector<8x768xbf16>,
    %45 = vector.extract_strided_slice %34 {offsets = [0, 21], sizes = [8, 768], strides = [1, 1]} : vector<8x896xbf16> to vector<8x768xbf16>
    %c40 = arith.constant 40 : index
    %c0_22 = arith.constant 0 : index
    %46 = vector.load %arg12[%c40, %c0_22] : memref<72x768xbf16, #tpu.memory_space<vmem>>, vector<8x768xbf16>
    tpu.vector_store %arg12[%c40, %c0_22], %45 {strides = array<i32>} : memref<72x768xbf16, #tpu.memory_space<vmem>>, vector<8x768xbf16>,
    %47 = vector.extract_strided_slice %34 {offsets = [0, 38], sizes = [8, 768], strides = [1, 1]} : vector<8x896xbf16> to vector<8x768xbf16>
    %c48 = arith.constant 48 : index
    %c0_23 = arith.constant 0 : index
    %48 = vector.load %arg12[%c48, %c0_23] : memref<72x768xbf16, #tpu.memory_space<vmem>>, vector<8x768xbf16>
    tpu.vector_store %arg12[%c48, %c0_23], %47 {strides = array<i32>} : memref<72x768xbf16, #tpu.memory_space<vmem>>, vector<8x768xbf16>,
    %49 = vector.extract_strided_slice %34 {offsets = [0, 39], sizes = [8, 768], strides = [1, 1]} : vector<8x896xbf16> to vector<8x768xbf16>
    %c56 = arith.constant 56 : index
    %c0_24 = arith.constant 0 : index
    %50 = vector.load %arg12[%c56, %c0_24] : memref<72x768xbf16, #tpu.memory_space<vmem>>, vector<8x768xbf16>
    tpu.vector_store %arg12[%c56, %c0_24], %49 {strides = array<i32>} : memref<72x768xbf16, #tpu.memory_space<vmem>>, vector<8x768xbf16>,
    %51 = vector.extract_strided_slice %34 {offsets = [0, 40], sizes = [8, 768], strides = [1, 1]} : vector<8x896xbf16> to vector<8x768xbf16>
    %c64 = arith.constant 64 : index
    %c0_25 = arith.constant 0 : index
    %52 = vector.load %arg12[%c64, %c0_25] : memref<72x768xbf16, #tpu.memory_space<vmem>>, vector<8x768xbf16>
    tpu.vector_store %arg12[%c64, %c0_25], %51 {strides = array<i32>} : memref<72x768xbf16, #tpu.memory_space<vmem>>, vector<8x768xbf16>,
    %c0_26 = arith.constant 0 : index
    %c0_27 = arith.constant 0 : index
    %53 = vector.load %arg1[%c0_26, %c0_27] : memref<8x72xbf16, #tpu.memory_space<vmem>>, vector<8x72xbf16>
    %c0_28 = arith.constant 0 : index
    %c0_29 = arith.constant 0 : index
    %54 = vector.load %arg12[%c0_28, %c0_29] : memref<72x768xbf16, #tpu.memory_space<vmem>>, vector<72x768xbf16>
    %cst_30 = arith.constant dense<0.000000e+00> : vector<8x768xf32>
    %55 = tpu.matmul %53, %54, %cst_30 {dimension_numbers = #tpu.dot_dimension_numbers<[1], [0], [0], [1], [0, 0, 1, 1], [], []>} : vector<8x72xbf16>, vector<72x768xbf16>, vector<8x768xf32> -> vector<8x768xf32>
    %56 = arith.truncf %55 : vector<8x768xf32> to vector<8x768xbf16>
    %c0_31 = arith.constant 0 : index
    %c0_32 = arith.constant 0 : index
    %57 = vector.load %arg9[%c0_31, %c0_32] : memref<8x768xbf16, #tpu.memory_space<vmem>>, vector<8x768xbf16>
    tpu.vector_store %arg9[%c0_31, %c0_32], %56 {strides = array<i32>} : memref<8x768xbf16, #tpu.memory_space<vmem>>, vector<8x768xbf16>,
    %c0_33 = arith.constant 0 : index
    %c0_34 = arith.constant 0 : index
    %58 = vector.load %arg8[%c0_33, %c0_34] : memref<1x768xbf16, #tpu.memory_space<vmem>>, vector<1x768xbf16>
    %59 = arith.extf %58 : vector<1x768xbf16> to vector<1x768xf32>
    %60 = vector.broadcast %59 : vector<1x768xf32> to vector<8x768xf32>
    %61 = arith.mulf %55, %60 : vector<8x768xf32>
    %cst_35 = arith.constant dense<0.000000e+00> : vector<8xf32>
    %62 = vector.multi_reduction <add>, %61, %cst_35 [1] : vector<8x768xf32> to vector<8xf32>
    %63 = vector.shape_cast %62 : vector<8xf32> to vector<8x1xf32>
    %64 = vector.shape_cast %63 : vector<8x1xf32> to vector<1x8x1xf32>
    %c0_36 = arith.constant 0 : index
    %c0_37 = arith.constant 0 : index
    %c0_38 = arith.constant 0 : index
    %65 = vector.load %arg10[%c0_36, %c0_37, %c0_38] : memref<1x8x1xf32, #tpu.memory_space<vmem>>, vector<1x8x1xf32>
    tpu.vector_store %arg10[%c0_36, %c0_37, %c0_38], %64 {strides = array<i32>} : memref<1x8x1xf32, #tpu.memory_space<vmem>>, vector<1x8x1xf32>,
    %66 = arith.mulf %61, %61 : vector<8x768xf32>
    %cst_39 = arith.constant dense<0.000000e+00> : vector<8xf32>
    %67 = vector.multi_reduction <add>, %66, %cst_39 [1] : vector<8x768xf32> to vector<8xf32>
    %68 = vector.shape_cast %67 : vector<8xf32> to vector<8x1xf32>
    %69 = vector.shape_cast %68 : vector<8x1xf32> to vector<1x8x1xf32>
    %c0_40 = arith.constant 0 : index
    %c0_41 = arith.constant 0 : index
    %c0_42 = arith.constant 0 : index
    %70 = vector.load %arg11[%c0_40, %c0_41, %c0_42] : memref<1x8x1xf32, #tpu.memory_space<vmem>>, vector<1x8x1xf32>
    tpu.vector_store %arg11[%c0_40, %c0_41, %c0_42], %69 {strides = array<i32>} : memref<1x8x1xf32, #tpu.memory_space<vmem>>, vector<1x8x1xf32>,
    return
  }
  func.func @transform_0(%arg0: i32) -> (i32, i32) {
    %c0_i32 = arith.constant 0 : i32
    %c0_i32_0 = arith.constant 0 : i32
    %c0_i32_1 = arith.constant 0 : i32
    return %c0_i32, %c0_i32_0 : i32, i32
  }
  func.func @transform_1(%arg0: i32) -> (i32, i32) {
    %c0_i32 = arith.constant 0 : i32
    %c0_i32_0 = arith.constant 0 : i32
    return %c0_i32, %arg0 : i32, i32
  }
  func.func @transform_2(%arg0: i32) -> (i32, i32) {
    %c1_i32 = arith.constant 1 : i32
    %0 = arith.addi %arg0, %c1_i32 : i32
    %c6_i32 = arith.constant 6 : i32
    %1 = arith.muli %0, %c6_i32 : i32
    %c5_i32 = arith.constant 5 : i32
    %2 = arith.minsi %1, %c5_i32 : i32
    %c0_i32 = arith.constant 0 : i32
    %c0_i32_0 = arith.constant 0 : i32
    return %c0_i32, %2 : i32, i32
  }
  func.func @transform_3(%arg0: i32) -> (i32, i32) {
    %c0_i32 = arith.constant 0 : i32
    %c0_i32_0 = arith.constant 0 : i32
    %c0_i32_1 = arith.constant 0 : i32
    return %c0_i32, %c0_i32_0 : i32, i32
  }
  func.func @transform_4(%arg0: i32) -> (i32, i32) {
    %c0_i32 = arith.constant 0 : i32
    %c0_i32_0 = arith.constant 0 : i32
    %c0_i32_1 = arith.constant 0 : i32
    return %c0_i32, %c0_i32_0 : i32, i32
  }
  func.func @transform_5(%arg0: i32) -> (i32, i32) {
    %c0_i32 = arith.constant 0 : i32
    %c0_i32_0 = arith.constant 0 : i32
    return %c0_i32, %arg0 : i32, i32
  }
  func.func @transform_6(%arg0: i32) -> (i32, i32) {
    %c1_i32 = arith.constant 1 : i32
    %0 = arith.addi %arg0, %c1_i32 : i32
    %c6_i32 = arith.constant 6 : i32
    %1 = arith.muli %0, %c6_i32 : i32
    %c5_i32 = arith.constant 5 : i32
    %2 = arith.minsi %1, %c5_i32 : i32
    %c0_i32 = arith.constant 0 : i32
    %c0_i32_0 = arith.constant 0 : i32
    return %c0_i32, %2 : i32, i32
  }
  func.func @transform_7(%arg0: i32) -> (i32, i32) {
    %c0_i32 = arith.constant 0 : i32
    %c0_i32_0 = arith.constant 0 : i32
    return %c0_i32, %arg0 : i32, i32
  }
  func.func @transform_8(%arg0: i32) -> (i32, i32) {
    %c0_i32 = arith.constant 0 : i32
    %c0_i32_0 = arith.constant 0 : i32
    return %c0_i32, %arg0 : i32, i32
  }
  func.func @transform_9(%arg0: i32) -> (i32, i32, i32) {
    %c0_i32 = arith.constant 0 : i32
    %c0_i32_0 = arith.constant 0 : i32
    %c0_i32_1 = arith.constant 0 : i32
    return %arg0, %c0_i32, %c0_i32_0 : i32, i32, i32
  }
  func.func @transform_10(%arg0: i32) -> (i32, i32, i32) {
    %c0_i32 = arith.constant 0 : i32
    %c0_i32_0 = arith.constant 0 : i32
    %c0_i32_1 = arith.constant 0 : i32
    return %arg0, %c0_i32, %c0_i32_0 : i32, i32, i32
  }
}

</mosaic_0001>

<bundles_post_ra>
// kernel: _lambda_.2
= control target key start
LH: loop header
LB: loop body
LE: loop exit
PB: predicated region body
PF: predicated region fallthrough
CT: control target
= control target key end

     0   :  { %v62_v0 = vlaneseq  ;;  %v748_v1 = vmov 1983009808   ;;  %s749_s25 = smov 108   ;;  %s750_s26 = smov 88   ;;  %v757_v21 = vmov 0   ;;  %vm117_vm0 = vcmask 1043456   ;;  %s1007_s1 = inlined_call_operand.vmem [shape: bf16[4,768], index: 1, kind: input, shape index: {}, may-alias: {1,2}]   ;;  %s1008_s2 = inlined_call_operand.vmem [shape: bf16[4,768], index: 2, kind: input, shape index: {}, may-alias: {1,2}]   ;;  %s1009_s0 = inlined_call_operand.vmem [shape: bf16[8,36], index: 0, kind: input, shape index: {}]   ;;  %s1010_s3 = inlined_call_operand.vmem [shape: bf16[1,768], index: 3, kind: input, shape index: {}]   ;;  %s1011_s4 = inlined_call_operand.vmem [shape: bf16[8,768], index: 4, kind: output, shape index: {0}]   ;;  %s1012_s5 = inlined_call_operand.vmem [shape: f32[1,8,1], index: 5, kind: output, shape index: {1}]   ;;  %s1013_s6 = inlined_call_operand.vmem [shape: f32[1,8,1], index: 6, kind: output, shape index: {2}]  }
   0x1   :  { %v60_v2 = vunpack.c.l.s4 %v748_v1  ;;  %v53_v3 = vld [vmem:[%s1007_s1] sm:$0xff]  ;;  %v677_v7 = vld.sshfl [vmem:[%s1007_s1 + $0x8] sm:$0x33 pattern:$0x76325410]  ;;  %s751_s1 = smov 90   ;;  %452 = vmatprep.mubr.bf16.mxu0 %v757_v21  ;;  %493 = vmatprep.mubr.bf16.mxu1 %v757_v21 }
   0x2   :  { %v796_v4 = vshrl.u32 %v62_v0, 7  ;;  %v58_v6 = vcombine.high %v53_v3, %v53_v3  ;;  %v82_v8 = vcombine.high %v677_v7, %v677_v7  ;;  %s752_s27 = smov 107   ;;  %s753_s28 = smov 89   ;;  %v723_v20 = vld [vmem:[%s1008_s2 + $0xa] ss:$0 sps:$4 sm:$0x33]  }
   0x3   :  { %v61_v5 = vunpack.c.0.s8 %v60_v2  ;;  %s754_s29 = smov 127   ;;  %s755_s30 = smov 126   ;;  %v104_v22 = vrot.slane %v723_v20, 6  ;;  %vm194_vm1 = vcmask 883712   ;;  %vm294_vm2 = vcmask 719872  }
   0x4   :  { %v680_v10 = vcombine.low %v677_v7, %v82_v8  ;;  %s756_s7 = smov 109   ;;  %vm244_vm3 = vcmask 736256   ;;  %vm219_vm4 = vcmask 875520   ;;  %vm269_vm5 = vcmask 728064  }
   0x5   :  { %v64_v9 = vsub.s32 %v61_v5, %v796_v4  ;;  %vm401_vm6 = vcmask 1041408   ;;  %vm119_vm7 = vcmask 1039360   ;;  %vm144_vm8 = vcmask 1031168  }
   0x6   :  { %97 = vst [vmem:[#allocation2 + $0x58] sm:$0x33] %v680_v10  ;;  %v103_v19 = vrot.slane %v680_v10, 6  ;;  %vm169_vm9 = vcmask 891904   ;;  %vm397_vm10 = vcmask 293888   ;;  %vm642_vm11 = vcmask 7168  }
   0x7   :  { %v65_v11 = vrot.slane %v53_v3, %v64_v9  ;;  %v72_v12 = vrot.slane %v58_v6, %v64_v9 }
   0x9   :  { %v73_v13 = vcombine.high %v65_v11, %v65_v11  ;;  %v74_v14 = vcombine.high %v72_v12, %v72_v12 }
   0xb   :  { %v678_v15 = vcombine.low %v65_v11, %v73_v13  ;;  %v679_v16 = vcombine.low %v72_v12, %v74_v14 }
   0xd   :  { %181 = vrot.lane.b32.xlu1 %v678_v15, %s749_s25  ;;  %95 = vst [vmem:[#allocation2 + $0x30] sm:$0x33] %v678_v15  ;;  %281 = vrot.lane.b32.xlu0 %v678_v15, %s750_s26  ;;  %96 = vst [vmem:[#allocation2] sm:$0x33] %v679_v16  ;;  %v101_v17 = vrot.slane %v678_v15, 6  ;;  %v102_v18 = vrot.slane %v679_v16, 6 }
  0x11   :  { %183 = vrot.lane.b32.xlu1 %v679_v16, %s749_s25  ;;  %283 = vrot.lane.b32.xlu0 %v679_v16, %s750_s26 }
  0x15   :  { %233 = vrot.lane.b32.xlu1 %v679_v16, %s751_s1  ;;  %231 = vrot.lane.b32.xlu0 %v678_v15, %s751_s1 }
  0x19   :  { %206 = vrot.lane.b32.xlu0 %v101_v17, %s752_s27  ;;  %208 = vrot.lane.b32.xlu1 %v102_v18, %s752_s27 }
  0x1d   :  { %256 = vrot.lane.b32.xlu0 %v101_v17, %s753_s28  ;;  %258 = vrot.lane.b32.xlu1 %v102_v18, %s753_s28 }
  0x21   :  { %105 = vrot.lane.b32.xlu0 %v101_v17, %s754_s29  ;;  %107 = vrot.lane.b32.xlu1 %v102_v18, %s754_s29 }
  0x25   :  { %131 = vrot.lane.b32.xlu0 %v678_v15, %s755_s30  ;;  %133 = vrot.lane.b32.xlu1 %v679_v16, %s755_s30 }
  0x29   :  { %156 = vrot.lane.b32.xlu0 %v101_v17, %s756_s7  ;;  %158 = vrot.lane.b32.xlu1 %v102_v18, %s756_s7 }
  0x2d   :  { %285 = vrot.lane.b32.xlu0 %v680_v10, %s750_s26  ;;  %185 = vrot.lane.b32.xlu1 %v680_v10, %s749_s25 }
  0x31   :  { %210 = vrot.lane.b32.xlu0 %v103_v19, %s752_s27  ;;  %235 = vrot.lane.b32.xlu1 %v680_v10, %s751_s1 }
  0x35   :  { %260 = vrot.lane.b32.xlu0 %v103_v19, %s753_s28  ;;  %287 = vrot.lane.b32.xlu1 %v723_v20, %s750_s26 }
  0x39   :  { %109 = vrot.lane.b32.xlu0 %v103_v19, %s754_s29  ;;  %135 = vrot.lane.b32.xlu1 %v680_v10, %s755_s30 }
  0x3d   :  { %160 = vrot.lane.b32.xlu0 %v103_v19, %s756_s7  ;;  %187 = vrot.lane.b32.xlu1 %v723_v20, %s749_s25 }
  0x41   :  { %212 = vrot.lane.b32.xlu0 %v104_v22, %s752_s27  ;;  %237 = vrot.lane.b32.xlu1 %v723_v20, %s751_s1 }
  0x45   :  { %262 = vrot.lane.b32.xlu0 %v104_v22, %s753_s28  ;;  %111 = vrot.lane.b32.xlu1 %v104_v22, %s754_s29 }
  0x49   :  { %137 = vrot.lane.b32.xlu0 %v723_v20, %s755_s30  ;;  %162 = vrot.lane.b32.xlu1 %v104_v22, %s756_s7 }
  0x7f   :  { %v182_v23 = vpop.permute.xlu1 %181  ;;  %v282_v24 = vpop.permute.xlu0 %281 }
  0x80   :  { %v189_v27 = vrot.slane %v182_v23, 4  ;;  %v289_v28 = vrot.slane %v282_v24, 4 }
  0x83   :  { %v827_v25 = vpop.permute.xlu1 %183  ;;  %v829_v26 = vpop.permute.xlu0 %283 }
  0x84   :  { %v190_v29 = vrot.slane %v827_v25, 4  ;;  %v290_v30 = vrot.slane %v829_v26, 4 }
  0x86   :  { %v193_v31 = vsel %vm117_vm0, %v189_v27, %v190_v29  ;;  %v293_v32 = vsel %vm117_vm0, %v289_v28, %v290_v30 }
  0x87   :  { %v195_v33 = vsel %vm194_vm1, %v182_v23, %v193_v31  ;;  %v295_v34 = vsel %vm294_vm2, %v282_v24, %v293_v32  ;;  %v841_v35 = vpop.permute.xlu1 %233  ;;  %v232_v36 = vpop.permute.xlu0 %231 }
  0x88   :  { %203 = vst [vmem:[#allocation2 + $0x8] sm:$0x33] %v195_v33  ;;  %303 = vst [vmem:[#allocation2 + $0x60] sm:$0x33] %v295_v34  ;;  %v240_v37 = vrot.slane %v841_v35, 4  ;;  %v239_v38 = vrot.slane %v232_v36, 4 }
  0x8a   :  { %v243_v39 = vsel %vm117_vm0, %v239_v38, %v240_v37 }
  0x8b   :  { %v245_v40 = vsel %vm244_vm3, %v232_v36, %v243_v39  ;;  %v207_v41 = vpop.permute.xlu0 %206  ;;  %v848_v42 = vpop.permute.xlu1 %208 }
  0x8c   :  { %253 = vst [vmem:[#allocation2 + $0x20] sm:$0x33] %v245_v40  ;;  %v214_v43 = vrot.slane %v207_v41, 4  ;;  %v215_v44 = vrot.slane %v848_v42, 4 }
  0x8e   :  { %v218_v45 = vsel %vm117_vm0, %v214_v43, %v215_v44 }
  0x8f   :  { %v220_v46 = vsel %vm219_vm4, %v207_v41, %v218_v45  ;;  %v257_v47 = vpop.permute.xlu0 %256  ;;  %v853_v48 = vpop.permute.xlu1 %258  ;;  %v319_v49 = vld [vmem:[#allocation2 + $0x60] sm:$0x33] }
  0x90   :  { %228 = vst [vmem:[#allocation2 + $0x8] sm:$0xcc] %v220_v46  ;;  %v264_v50 = vrot.slane %v257_v47, 4  ;;  %v265_v51 = vrot.slane %v853_v48, 4  ;;  %v695_v52 = vcombine.high %v319_v49, %v319_v49  ;;  %v694_v53 = vcombine.low %v319_v49, %v319_v49 }
  0x92   :  { %v268_v54 = vsel %vm117_vm0, %v264_v50, %v265_v51  ;;  %700 = vmatprep.subr.msk.bf16.mxu0 %vm401_vm6, %v695_v52  ;;  %v403_v55 = vsel %vm401_vm6, %v694_v53, 0 }
  0x93   :  { %v270_v56 = vsel %vm269_vm5, %v257_v47, %v268_v54  ;;  %431 = vmatpush1.bf16.msra.mxu0 %v403_v55  ;;  %v106_v57 = vpop.permute.xlu0 %105  ;;  %v862_v58 = vpop.permute.xlu1 %107 }
  0x94   :  { %278 = vst [vmem:[#allocation2 + $0x20] sm:$0xcc] %v270_v56  ;;  %v113_v59 = vrot.slane %v106_v57, 4  ;;  %v114_v60 = vrot.slane %v862_v58, 4 }
  0x96   :  { %v118_v61 = vsel %vm117_vm0, %v113_v59, %v114_v60 }
  0x97   :  { %v120_v62 = vsel %vm119_vm7, %v106_v57, %v118_v61  ;;  %v132_v63 = vpop.permute.xlu0 %131  ;;  %v869_v0 = vpop.permute.xlu1 %133 }
  0x98   :  { %128 = vst [vmem:[#allocation2 + $0x30] sm:$0xcc] %v120_v62  ;;  %v139_v1 = vrot.slane %v132_v63, 4  ;;  %v140_v2 = vrot.slane %v869_v0, 4 }
  0x9a   :  { %v143_v3 = vsel %vm117_vm0, %v139_v1, %v140_v2 }
  0x9b   :  { %v145_v5 = vsel %vm144_vm8, %v132_v63, %v143_v3  ;;  %v157_v6 = vpop.permute.xlu0 %156  ;;  %v876_v7 = vpop.permute.xlu1 %158  ;;  %v726_v8 = vld [vmem:[#allocation2 + $0xc] ss:$24 sps:$4 sm:$0xff]   ;;  %v728_v9 = vld [vmem:[#allocation2 + $0x8] ss:$24 sps:$4 sm:$0xff]  }
  0x9c   :  { %153 = vst [vmem:[#allocation2 + $0x18] sm:$0x33] %v145_v5  ;;  %v164_v10 = vrot.slane %v157_v6, 4  ;;  %v165_v11 = vrot.slane %v876_v7, 4  ;;  %432 = vmatprep.subr.bf16.mxu0 %v726_v8 }
  0x9d   :  { %433 = vmatpush1.bf16.msra.mxu0 %v728_v9 }
  0x9e   :  { %v168_v12 = vsel %vm117_vm0, %v164_v10, %v165_v11 }
  0x9f   :  { %v170_v13 = vsel %vm169_vm9, %v157_v6, %v168_v12  ;;  %v286_v14 = vpop.permute.xlu0 %285  ;;  %v883_v15 = vpop.permute.xlu1 %185 }
  0xa0   :  { %178 = vst [vmem:[#allocation2 + $0x18] sm:$0xcc] %v170_v13  ;;  %v291_v16 = vrot.slane %v286_v14, 4  ;;  %v191_v17 = vrot.slane %v883_v15, 4 }
  0xa2   :  { %v296_v18 = vsel %vm117_vm0, %v290_v30, %v291_v16  ;;  %v196_v19 = vsel %vm117_vm0, %v190_v29, %v191_v17 }
  0xa3   :  { %v297_v20 = vsel %vm294_vm2, %v829_v26, %v296_v18  ;;  %v197_v22 = vsel %vm194_vm1, %v827_v25, %v196_v19  ;;  %v896_v23 = vpop.permute.xlu0 %210  ;;  %v898_v24 = vpop.permute.xlu1 %235 }
  0xa4   :  { %304 = vst [vmem:[#allocation2 + $0x70] sm:$0x33] %v297_v20  ;;  %204 = vst [vmem:[#allocation2 + $0x48] sm:$0x33] %v197_v22  ;;  %v216_v27 = vrot.slane %v896_v23, 4  ;;  %v241_v28 = vrot.slane %v898_v24, 4 }
  0xa6   :  { %v221_v29 = vsel %vm117_vm0, %v215_v44, %v216_v27  ;;  %v246_v25 = vsel %vm117_vm0, %v240_v37, %v241_v28 }
  0xa7   :  { %v222_v26 = vsel %vm219_vm4, %v848_v42, %v221_v29  ;;  %v247_v30 = vsel %vm244_vm3, %v841_v35, %v246_v25  ;;  %v914_v31 = vpop.permute.xlu0 %260  ;;  %v288_v32 = vpop.permute.xlu1 %287  ;;  %v729_v33 = vld [vmem:[#allocation2 + $0x34] ss:$-24 sps:$4 sm:$0xff]   ;;  %v731_v34 = vld [vmem:[#allocation2 + $0x30] ss:$-24 sps:$4 sm:$0xff]   ;;  %v926_v35 = vld [vmem:[%s1009_s0] sm:$0xf] }
  0xa8   :  { %229 = vst [vmem:[#allocation2 + $0x48] sm:$0xcc] %v222_v26  ;;  %254 = vst [vmem:[#allocation2 + $0x10] sm:$0x33] %v247_v30  ;;  %v266_v36 = vrot.slane %v914_v31, 4  ;;  %v292_v38 = vrot.slane %v288_v32, 4  ;;  %434 = vmatprep.subr.bf16.mxu0 %v729_v33 }
  0xa9   :  { %435 = vmatpush1.bf16.msra.mxu0 %v731_v34 }
  0xaa   :  { %v271_v37 = vsel %vm117_vm0, %v265_v51, %v266_v36  ;;  %v298_v39 = vsel %vm117_vm0, %v291_v16, %v292_v38 }
  0xab   :  { %v272_v40 = vsel %vm269_vm5, %v853_v48, %v271_v37  ;;  %v299_v41 = vsel %vm294_vm2, %v286_v14, %v298_v39  ;;  %v110_v42 = vpop.permute.xlu0 %109  ;;  %v931_v43 = vpop.permute.xlu1 %135  ;;  %v320_v44 = vld [vmem:[#allocation2 + $0x70] sm:$0x33]  ;;  %v570_v37 = vld [vmem:[%s1010_s3] sm:$0x3f] }
  0xac   :  { %279 = vst [vmem:[#allocation2 + $0x10] sm:$0xcc] %v272_v40  ;;  %305 = vst [vmem:[#allocation2 + $0x28] sm:$0x33] %v299_v41  ;;  %v115_v45 = vrot.slane %v110_v42, 4  ;;  %v141_v46 = vrot.slane %v931_v43, 4  ;;  %v697_v47 = vcombine.high %v320_v44, %v320_v44  ;;  %v696_v49 = vcombine.low %v320_v44, %v320_v44  ;;  %701 = vmatmul.mubr.msk.bf16.vlgmr.msra.gmra.mxu0 %vm397_vm10, %v926_v35 }
  0xad   :  { %534 = vmatprep.mubr.bf16.mxu0 %v757_v21  ;;  %v571_v41 = vunpack.c.l.bf16 %v570_v37 }
  0xae   :  { %v121_v48 = vsel %vm117_vm0, %v114_v60, %v115_v45  ;;  %v146_v50 = vsel %vm117_vm0, %v140_v2, %v141_v46  ;;  %702 = vmatprep.subr.msk.bf16.mxu1 %vm401_vm6, %v697_v47  ;;  %v409_v51 = vsel %vm401_vm6, %v696_v49, 0 }
  0xaf   :  { %v122_v52 = vsel %vm119_vm7, %v862_v58, %v121_v48  ;;  %v147_v53 = vsel %vm144_vm8, %v869_v0, %v146_v50  ;;  %472 = vmatpush1.bf16.msra.mxu1 %v409_v51  ;;  %v161_v54 = vpop.permute.xlu0 %160  ;;  %v188_v55 = vpop.permute.xlu1 %187  ;;  %v589_v50 = vsub.s32 6, %v796_v4 }
  0xb0   :  { %129 = vst [vmem:[#allocation2] sm:$0xcc] %v122_v52  ;;  %154 = vst [vmem:[#allocation2 + $0x50] sm:$0x33] %v147_v53  ;;  %v166_v56 = vrot.slane %v161_v54, 4  ;;  %v192_v57 = vrot.slane %v188_v55, 4 }
  0xb2   :  { %v171_v59 = vsel %vm117_vm0, %v165_v11, %v166_v56  ;;  %v198_v60 = vsel %vm117_vm0, %v191_v17, %v192_v57 }
  0xb3   :  { %v172_v21 = vsel %vm169_vm9, %v876_v7, %v171_v59  ;;  %v199_v58 = vsel %vm194_vm1, %v883_v15, %v198_v60  ;;  %v213_v61 = vpop.permute.xlu0 %212  ;;  %v238_v62 = vpop.permute.xlu1 %237  ;;  %v734_v63 = vld [vmem:[#allocation2 + $0x4c] ss:$-56 sps:$4 sm:$0xff]   ;;  %v737_v5 = vld [vmem:[#allocation2 + $0x48] ss:$-56 sps:$4 sm:$0xff]  }
  0xb4   :  { %v321_v0 = vld [vmem:[#allocation2 + $0x28] sm:$0x33]  ;;  %179 = vst [vmem:[#allocation2 + $0x50] sm:$0xcc] %v172_v21  ;;  %205 = vst [vmem:[#allocation2 + $0x40] sm:$0x33] %v199_v58  ;;  %473 = vmatprep.subr.bf16.mxu1 %v734_v63 }
  0xb5   :  { %v217_v1 = vrot.slane %v213_v61, 4  ;;  %v242_v2 = vrot.slane %v238_v62, 4  ;;  %v699_v3 = vcombine.high %v321_v0, %v321_v0  ;;  %v698_v6 = vcombine.low %v321_v0, %v321_v0  ;;  %474 = vmatpush1.bf16.msra.mxu1 %v737_v5 }
  0xb7   :  { %v223_v8 = vsel %vm117_vm0, %v216_v27, %v217_v1  ;;  %v248_v7 = vsel %vm117_vm0, %v241_v28, %v242_v2  ;;  %704 = vmatprep.subr.msk.bf16.mxu0 %vm401_vm6, %v699_v3  ;;  %v415_v9 = vsel %vm401_vm6, %v698_v6, 0  ;;  %v263_v12 = vpop.permute.xlu0 %262  ;;  %v112_v13 = vpop.permute.xlu1 %111 }
  0xb8   :  { %v224_v10 = vsel %vm219_vm4, %v896_v23, %v223_v8  ;;  %v249_v11 = vsel %vm244_vm3, %v898_v24, %v248_v7  ;;  %513 = vmatpush1.bf16.msra.mxu0 %v415_v9  ;;  %v267_v14 = vrot.slane %v263_v12, 4  ;;  %v116_v15 = vrot.slane %v112_v13, 4 }
  0xb9   :  { %230 = vst [vmem:[#allocation2 + $0x40] sm:$0xcc] %v224_v10  ;;  %255 = vst [vmem:[#allocation2 + $0x38] sm:$0x33] %v249_v11 }
  0xba   :  { %v273_v16 = vsel %vm117_vm0, %v266_v36, %v267_v14  ;;  %v123_v17 = vsel %vm117_vm0, %v115_v45, %v116_v15 }
  0xbb   :  { %v274_v18 = vsel %vm269_vm5, %v914_v31, %v273_v16  ;;  %v124_v19 = vsel %vm119_vm7, %v110_v42, %v123_v17  ;;  %v138_v20 = vpop.permute.xlu0 %137  ;;  %v163_v22 = vpop.permute.xlu1 %162  ;;  %v739_v23 = vld [vmem:[#allocation2 + $0x4] ss:$80 sps:$4 sm:$0xff]   ;;  %v741_v24 = vld [vmem:[#allocation2] ss:$80 sps:$4 sm:$0xff]   ;;  %v577_v42 = vsub.s32 0, %v796_v4 }
  0xbc   :  { %280 = vst [vmem:[#allocation2 + $0x38] sm:$0xcc] %v274_v18  ;;  %130 = vst [vmem:[#allocation2 + $0x58] sm:$0xcc] %v124_v19  ;;  %v142_v27 = vrot.slane %v138_v20, 4  ;;  %v167_v28 = vrot.slane %v163_v22, 4  ;;  %475 = vmatprep.subr.bf16.mxu1 %v739_v23 }
  0xbd   :  { %476 = vmatpush1.bf16.msra.mxu1 %v741_v24  ;;  %v578_v45 = vrot.slane %v571_v41, %v577_v42 }
  0xbe   :  { %v148_v29 = vsel %vm117_vm0, %v141_v46, %v142_v27  ;;  %v173_v25 = vsel %vm117_vm0, %v166_v56, %v167_v28  ;;  %v585_v46 = vsub.s32 4, %v796_v4  ;;  %v572_v56 = vunpack.c.h.bf16 %v570_v37 }
  0xbf   :  { %v149_v26 = vsel %vm144_vm8, %v931_v43, %v148_v29  ;;  %v174_v30 = vsel %vm169_vm9, %v161_v54, %v173_v25  ;;  %v581_v43 = vsub.s32 2, %v796_v4  ;;  %v608_v47 = vrot.slane %v578_v45, %v577_v42 }
  0xc0   :  { %155 = vst [vmem:[#allocation2 + $0x68] sm:$0x33] %v149_v26  ;;  %180 = vst [vmem:[#allocation2 + $0x68] sm:$0xcc] %v174_v30  ;;  %703 = vmatmul.mubr.msk.bf16.vlgmr.msra.gmra.mxu1 %vm397_vm10, %v926_v35  ;;  %v586_v48 = vrot.slane %v571_v41, %v585_v46  ;;  %v590_v54 = vrot.slane %v571_v41, %v589_v50  ;;  %v594_v0 = vrot.slane %v572_v56, %v577_v42 }
  0xc1   :  { %v598_v5 = vrot.slane %v572_v56, %v581_v43 }
  0xc2   :  { %v616_v53 = vrot.slane %v586_v48, %v577_v42  ;;  %v620_v58 = vrot.slane %v590_v54, %v577_v42  ;;  %v624_v8 = vrot.slane %v594_v0, %v577_v42 }
  0xc3   :  { %v742_v31 = vld [vmem:[#allocation2 + $0x40] ss:$-8 sps:$4 sm:$0xff]   ;;  %v744_v32 = vld [vmem:[#allocation2 + $0x44] ss:$-8 sps:$4 sm:$0xff]   ;;  %v628_v10 = vrot.slane %v598_v5, %v577_v42 }
  0xc4   :  { %514 = vmatprep.subr.bf16.mxu0 %v744_v32 }
  0xc5   :  { %515 = vmatpush1.bf16.msra.mxu0 %v742_v31 }
  0xc7   :  { %v745_v33 = vld [vmem:[#allocation2 + $0x58] ss:$16 sps:$4 sm:$0xff]   ;;  %v747_v34 = vld [vmem:[#allocation2 + $0x5c] ss:$16 sps:$4 sm:$0xff]  }
  0xc8   :  { %516 = vmatprep.subr.bf16.mxu0 %v747_v34 }
  0xc9   :  { %517 = vmatpush1.bf16.msra.mxu0 %v745_v33 }
  0xcc   :  { %705 = vmatmul.mubr.msk.bf16.vlgmr.msra.gmra.mxu0 %vm397_vm10, %v926_v35  ;;  %v582_v35 = vrot.slane %v571_v41, %v581_v43 }
  0xce   :  { %v612_v49 = vrot.slane %v582_v35, %v577_v42 }
 0x16c   :  { %v454_v36 = vpop.f32.mrf.mxu0 }
 0x16d   :  { %v629_v51 = vmul.f32 %v608_v47, %v454_v36 }
 0x16e   :  { %v456_v38 = vpop.f32.mrf.mxu0 }
 0x16f   :  { %v709_v39 = vpack.c.bf16 %v456_v38, %v454_v36  ;;  %v630_v52 = vmul.f32 %v612_v49, %v456_v38  ;;  %v644_v57 = vmul.f32 %v629_v51, %v629_v51 }
 0x170   :  { %v458_v40 = vpop.f32.mrf.mxu0 }
 0x171   :  { %567 = vst [vmem:[%s1011_s4] sm:$0xff] %v709_v39  ;;  %v645_v59 = vmul.f32 %v630_v52, %v630_v52  ;;  %v635_v63 = vadd.f32 %v630_v52, %v629_v51 }
 0x172   :  { %v459_v44 = vpop.f32.mrf.mxu0 }
 0x173   :  { %v650_v4 = vadd.f32 %v645_v59, %v644_v57 }
 0x180   :  { %v495_v55 = vpop.f32.mrf.mxu1 }
 0x181   :  { %v631_v60 = vmul.f32 %v616_v53, %v495_v55 }
 0x182   :  { %v497_v21 = vpop.f32.mrf.mxu1 }
 0x183   :  { %v710_v61 = vpack.c.bf16 %v497_v21, %v495_v55  ;;  %v646_v1 = vmul.f32 %v631_v60, %v631_v60  ;;  %v632_v2 = vmul.f32 %v620_v58, %v497_v21  ;;  %v636_v6 = vadd.f32 %v635_v63, %v631_v60 }
 0x184   :  { %v499_v62 = vpop.f32.mrf.mxu1 }
 0x185   :  { %568 = vst [vmem:[%s1011_s4 + $0x8] sm:$0xff] %v710_v61  ;;  %v651_v7 = vadd.f32 %v650_v4, %v646_v1  ;;  %v647_v9 = vmul.f32 %v632_v2, %v632_v2  ;;  %v637_v12 = vadd.f32 %v636_v6, %v632_v2 }
 0x186   :  { %v500_v3 = vpop.f32.mrf.mxu1 }
 0x187   :  { %v652_v15 = vadd.f32 %v651_v7, %v647_v9 }
 0x18c   :  { %v536_v11 = vpop.f32.mrf.mxu0 }
 0x18d   :  { %v633_v13 = vmul.f32 %v624_v8, %v536_v11 }
 0x18e   :  { %v538_v14 = vpop.f32.mrf.mxu0 }
 0x18f   :  { %v648_v16 = vmul.f32 %v633_v13, %v633_v13  ;;  %v711_v17 = vpack.c.bf16 %v538_v14, %v536_v11  ;;  %v634_v18 = vmul.f32 %v628_v10, %v538_v14  ;;  %v638_v19 = vadd.f32 %v637_v12, %v633_v13 }
 0x190   :  { %v540_v20 = vpop.f32.mrf.mxu0 }
 0x191   :  { %569 = vst [vmem:[%s1011_s4 + $0x10] sm:$0xff] %v711_v17  ;;  %v639_v22 = vadd.f32 %v638_v19, %v634_v18  ;;  %v649_v23 = vmul.f32 %v634_v18, %v634_v18  ;;  %v653_v24 = vadd.f32 %v652_v15, %v648_v16 }
 0x192   :  { %v541_v27 = vpop.f32.mrf.mxu0 }
 0x193   :  { %640 = vadd.xlane.f32.xlu0 %v639_v22  ;;  %v654_v28 = vadd.f32 %v653_v24, %v649_v23 }
 0x195   :  { %655 = vadd.xlane.f32.xlu1 %v654_v28 }
 0x21c   :  { %v641_v29 = vpop.xlane.xlu0 %640 }
 0x21d   :  { %643 = vst.msk [vmem:[%s1012_s5] sm:$0xff] %vm642_vm11, %v641_v29 }
 0x21e   :  { %v656_v25 = vpop.xlane.xlu1 %655 }
 0x21f   :  { %657 = vst.msk [vmem:[%s1013_s6] sm:$0xff] %vm642_vm11, %v656_v25 }

// kernel: _lambda_.3
= control target key start
LH: loop header
LB: loop body
LE: loop exit
PB: predicated region body
PF: predicated region fallthrough
CT: control target
= control target key end

     0   :  { %v972_v0 = vmov 0   ;;  %v145_v5 = vlaneseq  ;;  %s973_s20 = smov 90   ;;  %s974_s21 = smov 88   ;;  %s1351_s3 = inlined_call_operand.vmem [shape: f32[8,1], index: 3, kind: input, shape index: {}]   ;;  %s1352_s4 = inlined_call_operand.vmem [shape: f32[8,1], index: 4, kind: input, shape index: {}]   ;;  %s1353_s5 = inlined_call_operand.vmem [shape: bf16[1,768], index: 5, kind: input, shape index: {}, may-alias: {5,6}]   ;;  %s1354_s1 = inlined_call_operand.vmem [shape: bf16[8,768], index: 1, kind: input, shape index: {}, may-alias: {1,2}]   ;;  %s1355_s6 = inlined_call_operand.vmem [shape: bf16[1,768], index: 6, kind: input, shape index: {}, may-alias: {5,6}]   ;;  %s1356_s2 = inlined_call_operand.vmem [shape: bf16[8,768], index: 2, kind: input, shape index: {}, may-alias: {1,2}]   ;;  %s1357_s0 = inlined_call_operand.vmem [shape: bf16[8,72], index: 0, kind: input, shape index: {}]   ;;  %s1358_s7 = inlined_call_operand.vmem [shape: bf16[1,768], index: 7, kind: input, shape index: {}]   ;;  %s1359_s8 = inlined_call_operand.vmem [shape: bf16[8,768], index: 8, kind: output, shape index: {0}]   ;;  %s1360_s9 = inlined_call_operand.vmem [shape: f32[1,8,1], index: 9, kind: output, shape index: {1}]   ;;  %s1361_s10 = inlined_call_operand.vmem [shape: f32[1,8,1], index: 10, kind: output, shape index: {2}]  }
   0x1   :  { %971 = vset.pattern.permute.xlu0 %v972_v0  ;;  %v100_v1 = vld [vmem:[%s1351_s3] sm:$0xff]  ;;  %683 = vmatprep.mubr.bf16.mxu0 %v972_v0  ;;  %v97_v18 = vld [vmem:[%s1354_s1 + $0x8] sm:$0xff]  ;;  %s975_s22 = smov 89   ;;  %v98_v53 = vld [vmem:[%s1354_s1 + $0x10] sm:$0xff]  ;;  %s976_s25 = smov 108  }
   0x2   :  { %111 = vperm.xlu0 %971, %v100_v1   ;;  %724 = vmatprep.mubr.bf16.mxu1 %v972_v0  ;;  %v101_v2 = vld [vmem:[%s1352_s4] sm:$0xff]  ;;  %v1049_v7 = vshrl.u32 %v145_v5, 7  ;;  %v105_v21 = vunpack.c.l.bf16 %v97_v18  ;;  %v106_v22 = vunpack.c.h.bf16 %v97_v18  ;;  %v107_v56 = vunpack.c.l.bf16 %v98_v53  ;;  %v910_v5 = vld [vmem:[%s1356_s2 + $0x14] sm:$0xf]  ;;  %s979_s30 = smov 109   ;;  %s980_s11 = smov 127  }
   0x3   :  { %v102_v3 = vld [vmem:[%s1353_s5] sm:$0x3f]  ;;  %v108_v57 = vunpack.c.h.bf16 %v98_v53 }
   0x4   :  { %vm137_vm0 = vcmp.ne.bf16.partialorder %v102_v3, 0  ;;  %v1052_v8 = vsub.s32 0, %v1049_v7  ;;  %v1055_v9 = vsub.s32 2, %v1049_v7  ;;  %v155_v11 = vsub.s32 4, %v1049_v7  ;;  %v96_v17 = vld [vmem:[%s1354_s1] sm:$0xff]  ;;  %s977_s1 = smov 107  }
   0x5   :  { %v138_v4 = vsel %vm137_vm0, 65537, %v972_v0  ;;  %v159_v12 = vsub.s32 6, %v1049_v7  ;;  %v103_v19 = vunpack.c.l.bf16 %v96_v17  ;;  %v104_v20 = vunpack.c.h.bf16 %v96_v17  ;;  %v911_v58 = vld [vmem:[%s1355_s6 + $0x5] sm:$0x1]  ;;  %s978_s6 = smov 126  }
   0x6   :  { %122 = vperm.xlu0 %971, %v101_v2   ;;  %v139_v6 = vunpack.c.l.b16 %v138_v4  ;;  %v140_v45 = vunpack.c.h.b16 %v138_v4  ;;  %vm228_vm13 = vcmp.ne.bf16.partialorder %v911_v58, 0 }
   0x7   :  { %v229_v63 = vsel %vm228_vm13, 65537, %v972_v0 }
   0x8   :  { %vm141_vm1 = vcmp.ne.s32.totalorder %v139_v6, 0  ;;  %vm142_vm10 = vcmp.ne.s32.totalorder %v140_v45, 0  ;;  %v230_v6 = vunpack.c.l.b16 %v229_v63 }
   0x9   :  { %v143_v10 = vsel %vm141_vm1, 1, %v972_v0  ;;  %v144_v52 = vsel %vm142_vm10, 1, %v972_v0  ;;  %vm278_vm10 = vcmask 1039360  }
   0xa   :  { %v148_v13 = vrot.slane %v143_v10, %v1052_v8  ;;  %v152_v14 = vrot.slane %v143_v10, %v1055_v9  ;;  %v156_v15 = vrot.slane %v143_v10, %v155_v11  ;;  %v160_v16 = vrot.slane %v143_v10, %v159_v12 }
   0xb   :  { %v164_v54 = vrot.slane %v144_v52, %v1052_v8  ;;  %v168_v55 = vrot.slane %v144_v52, %v1055_v9  ;;  %vm231_vm0 = vcmp.ne.s32.totalorder %v230_v6, 0 }
   0xc   :  { %vm169_vm2 = vcmp.ne.s32.totalorder %v148_v13, 0  ;;  %vm170_vm3 = vcmp.ne.s32.totalorder %v152_v14, 0  ;;  %vm171_vm4 = vcmp.ne.s32.totalorder %v156_v15, 0  ;;  %vm172_vm5 = vcmp.ne.s32.totalorder %v160_v16, 0 }
   0xd   :  { %v175_v23 = vsel %vm169_vm2, 1, %v972_v0  ;;  %v176_v24 = vsel %vm170_vm3, 1, %v972_v0  ;;  %v177_v26 = vsel %vm171_vm4, 1, %v972_v0  ;;  %v178_v27 = vsel %vm172_vm5, 1, %v972_v0 }
   0xe   :  { %v184_v28 = vrot.slane %v175_v23, %v1052_v8  ;;  %v188_v29 = vrot.slane %v176_v24, %v1052_v8  ;;  %v192_v34 = vrot.slane %v177_v26, %v1052_v8  ;;  %v196_v35 = vrot.slane %v178_v27, %v1052_v8 }
   0xf   :  { %vm173_vm11 = vcmp.ne.s32.totalorder %v164_v54, 0  ;;  %vm174_vm12 = vcmp.ne.s32.totalorder %v168_v55, 0  ;;  %v224_v14 = vunpack.c.l.bf16 %v910_v5  ;;  %v232_v18 = vsel %vm231_vm0, 1, %v972_v0 }
  0x10   :  { %vm205_vm6 = vcmp.eq.s32.totalorder %v184_v28, 1  ;;  %vm206_vm7 = vcmp.eq.s32.totalorder %v188_v29, 1  ;;  %vm207_vm8 = vcmp.eq.s32.totalorder %v192_v34, 1  ;;  %vm208_vm9 = vcmp.eq.s32.totalorder %v196_v35, 1 }
  0x11   :  { %v179_v61 = vsel %vm173_vm11, 1, %v972_v0  ;;  %v180_v62 = vsel %vm174_vm12, 1, %v972_v0  ;;  %vm276_vm2 = vcmask 1043456   ;;  %vm453_vm3 = vcmask 719872  }
  0x12   :  { %v200_v3 = vrot.slane %v179_v61, %v1052_v8  ;;  %v204_v4 = vrot.slane %v180_v62, %v1052_v8  ;;  %vm403_vm4 = vcmask 736256   ;;  %vm428_vm5 = vcmask 728064  }
  0x13   :  { %vm628_vm11 = vcmask 588800   ;;  %vm873_vm12 = vcmask 7168  }
  0x14   :  { %vm209_vm14 = vcmp.eq.s32.totalorder %v200_v3, 1  ;;  %vm210_vm15 = vcmp.eq.s32.totalorder %v204_v4, 1 }
  0x7d   :  { %v1074_v25 = vpop.permute.xlu0 %111 }
  0x7e   :  { %v114_v30 = vmul.f32 %v1074_v25, %v103_v19  ;;  %v115_v31 = vmul.f32 %v1074_v25, %v104_v20  ;;  %v116_v32 = vmul.f32 %v1074_v25, %v105_v21  ;;  %v117_v33 = vmul.f32 %v1074_v25, %v106_v22 }
  0x7f   :  { %v118_v59 = vmul.f32 %v1074_v25, %v107_v56  ;;  %v119_v60 = vmul.f32 %v1074_v25, %v108_v57  ;;  %v225_v17 = vmul.f32 %v224_v14, %v1074_v25  ;;  %v236_v21 = vrot.slane %v232_v18, %v1052_v8 }
  0x81   :  { %v1086_v36 = vpop.permute.xlu0 %122  ;;  %vm237_vm1 = vcmp.eq.s32.totalorder %v236_v21, 1 }
  0x82   :  { %v125_v37 = vadd.f32 %v1086_v36, %v114_v30  ;;  %v126_v38 = vadd.f32 %v1086_v36, %v115_v31  ;;  %v127_v39 = vadd.f32 %v1086_v36, %v116_v32  ;;  %v128_v40 = vadd.f32 %v1086_v36, %v117_v33 }
  0x83   :  { %v129_v1 = vadd.f32 %v1086_v36, %v118_v59  ;;  %v130_v2 = vadd.f32 %v1086_v36, %v119_v60  ;;  %v226_v20 = vadd.f32 %v225_v17, %v1086_v36 }
  0x84   :  { %v131_v41 = vmax.f32 %v125_v37, 0.0  ;;  %v132_v42 = vmax.f32 %v126_v38, 0.0  ;;  %v133_v43 = vmax.f32 %v127_v39, 0.0  ;;  %v134_v44 = vmax.f32 %v128_v40, 0.0 }
  0x85   :  { %v135_v10 = vmax.f32 %v129_v1, 0.0  ;;  %v136_v13 = vmax.f32 %v130_v2, 0.0  ;;  %v227_v22 = vmax.f32 %v226_v20, 0.0 }
  0x86   :  { %v211_v46 = vsel %vm205_vm6, %v131_v41, 0.0  ;;  %v212_v47 = vsel %vm206_vm7, %v132_v42, 0.0  ;;  %v213_v49 = vsel %vm207_vm8, %v133_v43, 0.0  ;;  %v214_v50 = vsel %vm208_vm9, %v134_v44, 0.0 }
  0x87   :  { %v1092_v48 = vpack.c.bf16 %v212_v47, %v211_v46  ;;  %v1098_v51 = vpack.c.bf16 %v214_v50, %v213_v49  ;;  %v215_v15 = vsel %vm209_vm14, %v135_v10, 0.0  ;;  %v216_v16 = vsel %vm210_vm15, %v136_v13, 0.0 }
  0x88   :  { %v1146_v19 = vpack.c.bf16 %v216_v16, %v215_v15  ;;  %v238_v23 = vsel %vm237_vm1, %v227_v22, 0.0  ;;  %vm353_vm6 = vcmask 883712   ;;  %vm378_vm7 = vcmask 875520  }
  0x89   :  { %390 = vrot.lane.b32.xlu0 %v1092_v48, %s973_s20  ;;  %440 = vrot.lane.b32.xlu1 %v1092_v48, %s974_s21  ;;  %v958_v24 = vpack.c.bf16 %v238_v23, %v238_v23  ;;  %vm303_vm8 = vcmask 1031168   ;;  %vm328_vm9 = vcmask 891904  }
  0x8d   :  { %415 = vrot.lane.b32.xlu0 %v1092_v48, %s975_s22  ;;  %442 = vrot.lane.b32.xlu1 %v1098_v51, %s974_s21 }
  0x91   :  { %340 = vrot.lane.b32.xlu0 %v1092_v48, %s976_s25  ;;  %392 = vrot.lane.b32.xlu1 %v1098_v51, %s973_s20 }
  0x95   :  { %365 = vrot.lane.b32.xlu0 %v1092_v48, %s977_s1  ;;  %417 = vrot.lane.b32.xlu1 %v1098_v51, %s975_s22 }
  0x99   :  { %290 = vrot.lane.b32.xlu0 %v1092_v48, %s978_s6  ;;  %342 = vrot.lane.b32.xlu1 %v1098_v51, %s976_s25 }
  0x9d   :  { %315 = vrot.lane.b32.xlu0 %v1092_v48, %s979_s30  ;;  %367 = vrot.lane.b32.xlu1 %v1098_v51, %s977_s1 }
  0xa1   :  { %264 = vrot.lane.b32.xlu0 %v1092_v48, %s980_s11  ;;  %292 = vrot.lane.b32.xlu1 %v1098_v51, %s978_s6 }
  0xa5   :  { %444 = vrot.lane.b32.xlu0 %v1146_v19, %s974_s21  ;;  %317 = vrot.lane.b32.xlu1 %v1098_v51, %s979_s30 }
  0xa9   :  { %419 = vrot.lane.b32.xlu0 %v1146_v19, %s975_s22  ;;  %266 = vrot.lane.b32.xlu1 %v1098_v51, %s980_s11 }
  0xad   :  { %344 = vrot.lane.b32.xlu0 %v1146_v19, %s976_s25  ;;  %394 = vrot.lane.b32.xlu1 %v1146_v19, %s973_s20 }
  0xb1   :  { %396 = vrot.lane.b32.xlu0 %v958_v24, %s973_s20  ;;  %446 = vrot.lane.b32.xlu1 %v958_v24, %s974_s21 }
  0xb5   :  { %294 = vrot.lane.b32.xlu0 %v1146_v19, %s978_s6  ;;  %369 = vrot.lane.b32.xlu1 %v1146_v19, %s977_s1 }
  0xb9   :  { %346 = vrot.lane.b32.xlu0 %v958_v24, %s976_s25  ;;  %421 = vrot.lane.b32.xlu1 %v958_v24, %s975_s22 }
  0xbd   :  { %268 = vrot.lane.b32.xlu0 %v1146_v19, %s980_s11  ;;  %319 = vrot.lane.b32.xlu1 %v1146_v19, %s979_s30 }
  0xc1   :  { %321 = vrot.lane.b32.xlu0 %v958_v24, %s979_s30  ;;  %371 = vrot.lane.b32.xlu1 %v958_v24, %s977_s1 }
  0xc5   :  { %296 = vrot.lane.b32.xlu1 %v958_v24, %s978_s6 }
  0xc9   :  { %270 = vrot.lane.b32.xlu1 %v958_v24, %s980_s11 }
  0xfb   :  { %v391_v25 = vpop.permute.xlu0 %390  ;;  %v441_v26 = vpop.permute.xlu1 %440 }
  0xfc   :  { %v448_v29 = vrot.slane %v441_v26, 4  ;;  %v398_v38 = vrot.slane %v391_v25, 4 }
  0xff   :  { %v416_v27 = vpop.permute.xlu0 %415  ;;  %v1175_v28 = vpop.permute.xlu1 %442 }
 0x100   :  { %v449_v30 = vrot.slane %v1175_v28, 4  ;;  %v423_v42 = vrot.slane %v416_v27, 4 }
 0x102   :  { %v452_v31 = vsel %vm276_vm2, %v448_v29, %v449_v30 }
 0x103   :  { %v341_v32 = vpop.permute.xlu0 %340  ;;  %v1179_v33 = vpop.permute.xlu1 %392  ;;  %v454_v34 = vsel %vm453_vm3, %v441_v26, %v452_v31 }
 0x104   :  { %v399_v35 = vrot.slane %v1179_v33, 4  ;;  %v941_v36 = vcombine.high %v454_v34, %v454_v34  ;;  %v940_v37 = vcombine.low %v454_v34, %v454_v34  ;;  %v348_v55 = vrot.slane %v341_v32, 4 }
 0x106   :  { %946 = vmatprep.subr.msk.bf16.mxu0 %vm276_vm2, %v941_v36  ;;  %v634_v39 = vsel %vm276_vm2, %v940_v37, 0  ;;  %v402_v43 = vsel %vm276_vm2, %v398_v38, %v399_v35 }
 0x107   :  { %v366_v40 = vpop.permute.xlu0 %365  ;;  %658 = vmatpush1.bf16.msra.mxu0 %v634_v39  ;;  %v1185_v41 = vpop.permute.xlu1 %417  ;;  %v404_v49 = vsel %vm403_vm4, %v391_v25, %v402_v43 }
 0x108   :  { %v424_v44 = vrot.slane %v1185_v41, 4  ;;  %v373_v58 = vrot.slane %v366_v40, 4 }
 0x10a   :  { %v427_v45 = vsel %vm276_vm2, %v423_v42, %v424_v44 }
 0x10b   :  { %v291_v46 = vpop.permute.xlu0 %290  ;;  %v1194_v47 = vpop.permute.xlu1 %342  ;;  %v429_v50 = vsel %vm428_vm5, %v416_v27, %v427_v45 }
 0x10c   :  { %v349_v52 = vrot.slane %v1194_v47, 4  ;;  %v935_v53 = vcombine.high %v404_v49, %v429_v50  ;;  %v934_v54 = vcombine.low %v404_v49, %v429_v50  ;;  %v298_v6 = vrot.slane %v291_v46, 4 }
 0x10e   :  { %659 = vmatprep.subr.bf16.mxu0 %v935_v53  ;;  %v352_v59 = vsel %vm276_vm2, %v348_v55, %v349_v52 }
 0x10f   :  { %v316_v56 = vpop.permute.xlu0 %315  ;;  %660 = vmatpush1.bf16.msra.mxu0 %v934_v54  ;;  %v1199_v57 = vpop.permute.xlu1 %367  ;;  %v354_v1 = vsel %vm353_vm6, %v341_v32, %v352_v59 }
 0x110   :  { %v374_v60 = vrot.slane %v1199_v57, 4  ;;  %v323_v14 = vrot.slane %v316_v56, 4 }
 0x112   :  { %v377_v61 = vsel %vm276_vm2, %v373_v58, %v374_v60 }
 0x113   :  { %v265_v62 = vpop.permute.xlu0 %264  ;;  %v1208_v63 = vpop.permute.xlu1 %292  ;;  %v379_v2 = vsel %vm378_vm7, %v366_v40, %v377_v61 }
 0x114   :  { %v299_v3 = vrot.slane %v1208_v63, 4  ;;  %v929_v4 = vcombine.high %v354_v1, %v379_v2  ;;  %v928_v5 = vcombine.low %v354_v1, %v379_v2  ;;  %v272_v21 = vrot.slane %v265_v62, 4 }
 0x116   :  { %661 = vmatprep.subr.bf16.mxu0 %v929_v4  ;;  %v302_v15 = vsel %vm276_vm2, %v298_v6, %v299_v3 }
 0x117   :  { %v445_v10 = vpop.permute.xlu0 %444  ;;  %662 = vmatpush1.bf16.msra.mxu0 %v928_v5  ;;  %v1213_v13 = vpop.permute.xlu1 %317  ;;  %v304_v24 = vsel %vm303_vm8, %v291_v46, %v302_v15 }
 0x118   :  { %v450_v16 = vrot.slane %v445_v10, 4  ;;  %v324_v17 = vrot.slane %v1213_v13, 4 }
 0x11a   :  { %v327_v18 = vsel %vm276_vm2, %v323_v14, %v324_v17  ;;  %v455_v20 = vsel %vm276_vm2, %v449_v30, %v450_v16 }
 0x11b   :  { %v1223_v22 = vpop.permute.xlu0 %419  ;;  %v1225_v23 = vpop.permute.xlu1 %266  ;;  %v329_v25 = vsel %vm328_vm9, %v316_v56, %v327_v18  ;;  %v456_v26 = vsel %vm453_vm3, %v1175_v28, %v455_v20 }
 0x11c   :  { %v425_v27 = vrot.slane %v1223_v22, 4  ;;  %v273_v29 = vrot.slane %v1225_v23, 4  ;;  %v923_v31 = vcombine.high %v304_v24, %v329_v25  ;;  %v943_v32 = vcombine.high %v456_v26, %v456_v26 }
 0x11d   :  { %v922_v30 = vcombine.low %v304_v24, %v329_v25  ;;  %v942_v34 = vcombine.low %v456_v26, %v456_v26 }
 0x11e   :  { %v277_v36 = vsel %vm276_vm2, %v272_v21, %v273_v29  ;;  %663 = vmatprep.subr.bf16.mxu0 %v923_v31  ;;  %948 = vmatprep.subr.msk.bf16.mxu1 %vm276_vm2, %v943_v32  ;;  %v430_v40 = vsel %vm276_vm2, %v424_v44, %v425_v27 }
 0x11f   :  { %v1237_v37 = vpop.permute.xlu0 %344  ;;  %664 = vmatpush1.bf16.msra.mxu0 %v922_v30  ;;  %v640_v28 = vsel %vm276_vm2, %v942_v34, 0  ;;  %v395_v38 = vpop.permute.xlu1 %394  ;;  %v279_v39 = vsel %vm278_vm10, %v265_v62, %v277_v36  ;;  %v431_v44 = vsel %vm428_vm5, %v1185_v41, %v430_v40 }
 0x120   :  { %699 = vmatpush1.bf16.msra.mxu1 %v640_v28  ;;  %v400_v42 = vrot.slane %v395_v38, 4  ;;  %v917_v43 = vcombine.high %v1092_v48, %v279_v39  ;;  %v916_v45 = vcombine.low %v1092_v48, %v279_v39  ;;  %v350_v49 = vrot.slane %v1237_v37, 4  ;;  %v1257_v48 = vld [vmem:[%s1357_s0] sm:$0xf] }
 0x122   :  { %v405_v46 = vsel %vm276_vm2, %v399_v35, %v400_v42  ;;  %665 = vmatprep.subr.bf16.mxu0 %v917_v43 }
 0x123   :  { %v397_v50 = vpop.permute.xlu0 %396  ;;  %666 = vmatpush1.bf16.msra.mxu0 %v916_v45  ;;  %v447_v53 = vpop.permute.xlu1 %446  ;;  %v406_v54 = vsel %vm403_vm4, %v1179_v33, %v405_v46  ;;  %v355_v33 = vsel %vm276_vm2, %v349_v52, %v350_v49 }
 0x124   :  { %v451_v55 = vrot.slane %v447_v53, 4  ;;  %v937_v35 = vcombine.high %v406_v54, %v431_v44  ;;  %v936_v56 = vcombine.low %v406_v54, %v431_v44  ;;  %v401_v62 = vrot.slane %v397_v50, 4 }
 0x126   :  { %v457_v58 = vsel %vm276_vm2, %v450_v16, %v451_v55  ;;  %700 = vmatprep.subr.bf16.mxu1 %v937_v35  ;;  %947 = vmatmul.mubr.msk.bf16.vlgmr.msra.gmra.mxu0 %vm628_vm11, %v1257_v48  ;;  %v407_v16 = vsel %vm276_vm2, %v400_v42, %v401_v62 }
 0x127   :  { %v458_v41 = vsel %vm453_vm3, %v445_v10, %v457_v58  ;;  %v1266_v59 = vpop.permute.xlu0 %294  ;;  %701 = vmatpush1.bf16.msra.mxu1 %v936_v56  ;;  %v370_v61 = vpop.permute.xlu1 %369  ;;  %765 = vmatprep.mubr.bf16.mxu0 %v972_v0  ;;  %v356_v0 = vsel %vm353_vm6, %v1194_v47, %v355_v33  ;;  %v408_v47 = vsel %vm403_vm4, %v395_v38, %v407_v16 }
 0x128   :  { %v375_v1 = vrot.slane %v370_v61, 4  ;;  %v945_v2 = vcombine.high %v458_v41, %v458_v41  ;;  %v944_v4 = vcombine.low %v458_v41, %v458_v41  ;;  %v300_v6 = vrot.slane %v1266_v59, 4 }
 0x12a   :  { %v380_v5 = vsel %vm276_vm2, %v374_v60, %v375_v1  ;;  %950 = vmatprep.subr.msk.bf16.mxu0 %vm276_vm2, %v945_v2  ;;  %v646_v52 = vsel %vm276_vm2, %v944_v4, 0  ;;  %v305_v24 = vsel %vm276_vm2, %v299_v3, %v300_v6 }
 0x12b   :  { %v347_v10 = vpop.permute.xlu0 %346  ;;  %v422_v14 = vpop.permute.xlu1 %421  ;;  %740 = vmatpush1.bf16.msra.mxu0 %v646_v52  ;;  %v381_v15 = vsel %vm378_vm7, %v1199_v57, %v380_v5 }
 0x12c   :  { %v426_v18 = vrot.slane %v422_v14, 4  ;;  %v931_v20 = vcombine.high %v356_v0, %v381_v15  ;;  %v930_v60 = vcombine.low %v356_v0, %v381_v15  ;;  %v351_v25 = vrot.slane %v347_v10, 4 }
 0x12e   :  { %v432_v21 = vsel %vm276_vm2, %v425_v27, %v426_v18  ;;  %702 = vmatprep.subr.bf16.mxu1 %v931_v20  ;;  %v357_v28 = vsel %vm276_vm2, %v350_v49, %v351_v25 }
 0x12f   :  { %v269_v26 = vpop.permute.xlu0 %268  ;;  %703 = vmatpush1.bf16.msra.mxu1 %v930_v60  ;;  %v320_v31 = vpop.permute.xlu1 %319  ;;  %v433_v57 = vsel %vm428_vm5, %v1223_v22, %v432_v21  ;;  %v306_v22 = vsel %vm303_vm8, %v1208_v63, %v305_v24  ;;  %v358_v63 = vsel %vm353_vm6, %v1237_v37, %v357_v28 }
 0x130   :  { %v274_v32 = vrot.slane %v269_v26, 4  ;;  %v325_v30 = vrot.slane %v320_v31, 4  ;;  %v938_v34 = vcombine.low %v408_v47, %v433_v57  ;;  %v939_v36 = vcombine.high %v408_v47, %v433_v57 }
 0x132   :  { %v280_v27 = vsel %vm276_vm2, %v273_v29, %v274_v32  ;;  %v330_v3 = vsel %vm276_vm2, %v324_v17, %v325_v30  ;;  %741 = vmatprep.subr.bf16.mxu0 %v939_v36 }
 0x133   :  { %v322_v39 = vpop.permute.xlu0 %321  ;;  %v372_v38 = vpop.permute.xlu1 %371  ;;  %742 = vmatpush1.bf16.msra.mxu0 %v938_v34  ;;  %v331_v40 = vsel %vm328_vm9, %v1213_v13, %v330_v3  ;;  %v281_v42 = vsel %vm278_vm10, %v1225_v23, %v280_v27 }
 0x134   :  { %v326_v29 = vrot.slane %v322_v39, 4  ;;  %v376_v43 = vrot.slane %v372_v38, 4  ;;  %v925_v45 = vcombine.high %v306_v22, %v331_v40  ;;  %v924_v46 = vcombine.low %v306_v22, %v331_v40 }
 0x135   :  { %v919_v49 = vcombine.high %v1098_v51, %v281_v42  ;;  %v918_v55 = vcombine.low %v1098_v51, %v281_v42 }
 0x136   :  { %v382_v17 = vsel %vm276_vm2, %v375_v1, %v376_v43  ;;  %704 = vmatprep.subr.bf16.mxu1 %v925_v45  ;;  %v332_v13 = vsel %vm276_vm2, %v325_v30, %v326_v29 }
 0x137   :  { %705 = vmatpush1.bf16.msra.mxu1 %v924_v46  ;;  %v297_v50 = vpop.permute.xlu1 %296  ;;  %v383_v53 = vsel %vm378_vm7, %v370_v61, %v382_v17  ;;  %v333_v37 = vsel %vm328_vm9, %v320_v31, %v332_v13 }
 0x138   :  { %v301_v54 = vrot.slane %v297_v50, 4  ;;  %706 = vmatprep.subr.bf16.mxu1 %v919_v49  ;;  %v932_v23 = vcombine.low %v358_v63, %v383_v53  ;;  %v933_v44 = vcombine.high %v358_v63, %v383_v53 }
 0x13a   :  { %v307_v35 = vsel %vm276_vm2, %v300_v6, %v301_v54  ;;  %743 = vmatprep.subr.bf16.mxu0 %v933_v44  ;;  %v801_v6 = vld [vmem:[%s1358_s7] sm:$0x3f] }
 0x13b   :  { %707 = vmatpush1.bf16.msra.mxu1 %v918_v55  ;;  %v271_v56 = vpop.permute.xlu1 %270  ;;  %744 = vmatpush1.bf16.msra.mxu0 %v932_v23  ;;  %v308_v58 = vsel %vm303_vm8, %v1266_v59, %v307_v35  ;;  %v802_v14 = vunpack.c.l.bf16 %v801_v6  ;;  %v803_v24 = vunpack.c.h.bf16 %v801_v6 }
 0x13c   :  { %v275_v33 = vrot.slane %v271_v56, 4  ;;  %v926_v41 = vcombine.low %v308_v58, %v333_v37  ;;  %v927_v61 = vcombine.high %v308_v58, %v333_v37 }
 0x13d   :  { %v813_v0 = vrot.slane %v802_v14, %v1055_v9  ;;  %v817_v16 = vrot.slane %v802_v14, %v155_v11  ;;  %v821_v18 = vrot.slane %v802_v14, %v159_v12  ;;  %v829_v34 = vrot.slane %v803_v24, %v1055_v9 }
 0x13e   :  { %v282_v62 = vsel %vm276_vm2, %v274_v32, %v275_v33  ;;  %949 = vmatmul.mubr.msk.bf16.vlgmr.msra.gmra.mxu1 %vm628_vm11, %v1257_v48  ;;  %745 = vmatprep.subr.bf16.mxu0 %v927_v61  ;;  %v825_v32 = vrot.slane %v803_v24, %v1052_v8 }
 0x13f   :  { %746 = vmatpush1.bf16.msra.mxu0 %v926_v41  ;;  %v283_v51 = vsel %vm278_vm10, %v269_v26, %v282_v62  ;;  %v843_v15 = vrot.slane %v813_v0, %v1052_v8  ;;  %v847_v21 = vrot.slane %v817_v16, %v1052_v8  ;;  %v851_v25 = vrot.slane %v821_v18, %v1052_v8 }
 0x140   :  { %v920_v1 = vcombine.low %v1146_v19, %v283_v51  ;;  %v921_v2 = vcombine.high %v1146_v19, %v283_v51  ;;  %v809_v19 = vrot.slane %v802_v14, %v1052_v8  ;;  %v855_v39 = vrot.slane %v825_v32, %v1052_v8 }
 0x141   :  { %v859_v42 = vrot.slane %v829_v34, %v1052_v8 }
 0x142   :  { %747 = vmatprep.subr.bf16.mxu0 %v921_v2 }
 0x143   :  { %748 = vmatpush1.bf16.msra.mxu0 %v920_v1 }
 0x146   :  { %951 = vmatmul.mubr.msk.bf16.vlgmr.msra.gmra.mxu0 %vm628_vm11, %v1257_v48  ;;  %v839_v48 = vrot.slane %v809_v19, %v1052_v8 }
 0x1e6   :  { %v685_v59 = vpop.f32.mrf.mxu0 }
 0x1e7   :  { %v860_v20 = vmul.f32 %v839_v48, %v685_v59 }
 0x1e8   :  { %v687_v4 = vpop.f32.mrf.mxu0 }
 0x1e9   :  { %v959_v5 = vpack.c.bf16 %v687_v4, %v685_v59  ;;  %v861_v60 = vmul.f32 %v843_v15, %v687_v4  ;;  %v875_v26 = vmul.f32 %v860_v20, %v860_v20 }
 0x1ea   :  { %v689_v52 = vpop.f32.mrf.mxu0 }
 0x1eb   :  { %798 = vst [vmem:[%s1359_s8] sm:$0xff] %v959_v5  ;;  %v876_v31 = vmul.f32 %v861_v60, %v861_v60  ;;  %v866_v11 = vadd.f32 %v861_v60, %v860_v20 }
 0x1ec   :  { %v690_v10 = vpop.f32.mrf.mxu0 }
 0x1ed   :  { %v881_v27 = vadd.f32 %v876_v31, %v875_v26 }
 0x1fe   :  { %v726_v47 = vpop.f32.mrf.mxu1 }
 0x1ff   :  { %v862_v57 = vmul.f32 %v847_v21, %v726_v47 }
 0x200   :  { %v728_v30 = vpop.f32.mrf.mxu1 }
 0x201   :  { %v877_v36 = vmul.f32 %v862_v57, %v862_v57  ;;  %v960_v7 = vpack.c.bf16 %v728_v30, %v726_v47  ;;  %v863_v12 = vmul.f32 %v851_v25, %v728_v30  ;;  %v867_v28 = vadd.f32 %v866_v11, %v862_v57 }
 0x202   :  { %v730_v3 = vpop.f32.mrf.mxu1 }
 0x203   :  { %799 = vst [vmem:[%s1359_s8 + $0x8] sm:$0xff] %v960_v7  ;;  %v882_v38 = vadd.f32 %v881_v27, %v877_v36  ;;  %v878_v22 = vmul.f32 %v863_v12, %v863_v12  ;;  %v868_v9 = vadd.f32 %v867_v28, %v863_v12 }
 0x204   :  { %v731_v40 = vpop.f32.mrf.mxu1 }
 0x205   :  { %v883_v46 = vadd.f32 %v882_v38, %v878_v22 }
 0x206   :  { %v767_v29 = vpop.f32.mrf.mxu0 }
 0x207   :  { %v864_v43 = vmul.f32 %v855_v39, %v767_v29 }
 0x208   :  { %v769_v45 = vpop.f32.mrf.mxu0 }
 0x209   :  { %v879_v17 = vmul.f32 %v864_v43, %v864_v43  ;;  %v961_v49 = vpack.c.bf16 %v769_v45, %v767_v29  ;;  %v865_v50 = vmul.f32 %v859_v42, %v769_v45  ;;  %v869_v63 = vadd.f32 %v868_v9, %v864_v43 }
 0x20a   :  { %v771_v53 = vpop.f32.mrf.mxu0 }
 0x20b   :  { %800 = vst [vmem:[%s1359_s8 + $0x10] sm:$0xff] %v961_v49  ;;  %v870_v13 = vadd.f32 %v869_v63, %v865_v50  ;;  %v880_v54 = vmul.f32 %v865_v50, %v865_v50  ;;  %v884_v23 = vadd.f32 %v883_v46, %v879_v17 }
 0x20c   :  { %v772_v44 = vpop.f32.mrf.mxu0 }
 0x20d   :  { %871 = vadd.xlane.f32.xlu0 %v870_v13  ;;  %v885_v8 = vadd.f32 %v884_v23, %v880_v54 }
 0x20f   :  { %886 = vadd.xlane.f32.xlu1 %v885_v8 }
 0x296   :  { %v872_v55 = vpop.xlane.xlu0 %871 }
 0x297   :  { %874 = vst.msk [vmem:[%s1360_s9] sm:$0xff] %vm873_vm12, %v872_v55 }
 0x298   :  { %v887_v35 = vpop.xlane.xlu1 %886 }
 0x299   :  { %888 = vst.msk [vmem:[%s1361_s10] sm:$0xff] %vm873_vm12, %v887_v35 }

</bundles_post_ra>
